<compile_context>
chip_gen: v5e
topology: v5e:2x2
jax: 0.10.0
libtpu: 0.0.40
codegen_flags: <defaults>
</compile_context>

<pallas_src>
import jax
import jax.numpy as jnp
from jax.experimental import pallas as pl
from jax.experimental.pallas import tpu as pltpu


# --------------------------------------------------------------------------
# Fused kernel: in-register concat -> SESeg1D -> (BN-folded) fuse -> merged heads.
# --------------------------------------------------------------------------
def _emotic_fused_kernel(x0_ref, x1_ref, x2_ref, x3_ref,
                         pool_ref, w1_ref, b1_ref, w2_ref, b2_ref,
                         expand_ref, wf_ref, bf_ref, wh_ref, bh_ref, out_ref):
    # Lane-aligned in-kernel concat (256 | 128 | 128 | 256 -> 768), all bf16.
    x = jnp.concatenate(
        [x0_ref[...], x1_ref[...], x2_ref[...], x3_ref[...]], axis=-1)   # (TB, F) bf16

    # SESeg1D: adaptive avg-pool over each length-L segment == x @ P.
    fea_s = jnp.dot(x, pool_ref[...],
                    preferred_element_type=jnp.float32)                  # (TB, C)
    fea_z = jnp.maximum(
        jnp.dot(fea_s.astype(jnp.bfloat16), w1_ref[...],
                preferred_element_type=jnp.float32) + b1_ref[...], 0.0)  # fc1 + ReLU
    logits = (jnp.dot(fea_z.astype(jnp.bfloat16), w2_ref[...],
                      preferred_element_type=jnp.float32) + b2_ref[...]) # (TB, C)

    # Exact softmax over the channel dim (PyTorch nn.Softmax(dim=1) on (B, C)), f32.
    m = jnp.max(logits, axis=-1, keepdims=True)
    e = jnp.exp(logits - m)
    attn = e / jnp.sum(e, axis=-1, keepdims=True)

    # Expand per-channel gate to per-feature scale (single-pass bf16 MXU matmul).
    scale = jnp.dot(attn.astype(jnp.bfloat16), expand_ref[...],
                    preferred_element_type=jnp.float32)                  # (TB, F) f32
    fused = (x.astype(jnp.float32) * scale).astype(jnp.bfloat16)         # SE-gated feats

    # fuse: Linear(F, 256) with eval-mode BatchNorm1d folded into wf/bf, + ReLU.
    h = jnp.maximum(
        jnp.dot(fused, wf_ref[...], preferred_element_type=jnp.float32)
        + bf_ref[...], 0.0)
    # TODO(synk): Dropout(p=0.5) is identity in eval mode; training-mode mask not implemented.

    # Merged fc_cat | fc_cont, zero-padded to a 128-lane output slab (unmasked vst).
    out_ref[...] = (jnp.dot(h.astype(jnp.bfloat16), wh_ref[...],
                            preferred_element_type=jnp.float32) + bh_ref[...])


def _round_up(x, m):
    return ((x + m - 1) // m) * m


def _batch_tile(B):
    """Batch tile policy: sublane-aligned, >=2 grid steps when B > 8, capped at 1024."""
    if B <= 8:
        return 8
    return min(1024, _round_up(-(-B // 2), 8))


def _fused_forward(kp, feats):
    """feats: 4 per-stream (B, n_s) bf16 tensors -> (cat (B,26), cont (B,3))."""
    B = feats[0].shape[0]
    TB = _batch_tile(B)
    padded_B = _round_up(max(B, TB), TB)
    if padded_B != B:
        feats = tuple(jnp.pad(f, ((0, padded_B - B), (0, 0))) for f in feats)
    grid = (padded_B // TB,)

    def _row(n):                       # per-stream row-tiled input
        return pl.BlockSpec((TB, n), lambda i: (i, 0))

    def _const(a):                     # resident weight (constant index_map)
        return pl.BlockSpec(a.shape, lambda i: (0, 0))

    out = pl.pallas_call(
        _emotic_fused_kernel,
        out_shape=jax.ShapeDtypeStruct((padded_B, 128), jnp.float32),
        grid=grid,
        in_specs=[_row(f.shape[1]) for f in feats] + [
            _const(kp["pool"]),                          # (F, C)  segment-mean matrix
            _const(kp["w1"]), _const(kp["b1"]),          # SE fc1
            _const(kp["w2"]), _const(kp["b2"]),          # SE fc2
            _const(kp["expand"]),                        # (C, F)  0/1 gate expansion (bf16)
            _const(kp["wf"]), _const(kp["bf"]),          # fuse Linear (BN folded)
            _const(kp["wh"]), _const(kp["bh"]),          # merged fc_cat|fc_cont
        ],
        out_specs=pl.BlockSpec((TB, 128), lambda i: (i, 0)),
        compiler_params=pltpu.CompilerParams(
            dimension_semantics=("parallel",)),
    )(*feats, kp["pool"], kp["w1"], kp["b1"], kp["w2"], kp["b2"],
      kp["expand"], kp["wf"], kp["bf"], kp["wh"], kp["bh"])

    return out[:B, :26], out[:B, 26:29]


# --------------------------------------------------------------------------
# Parameter construction (deterministic, synthetic) + offline folding.
# --------------------------------------------------------------------------
def _linear_params(key, n_in, n_out, scale=0.05):
    kw, kb = jax.random.split(key)
    w = scale * jax.random.normal(kw, (n_in, n_out), jnp.float32)
    b = scale * jax.random.normal(kb, (n_out,), jnp.float32)
    return w, b


def make_params(key, *, num_features=(256, 128, 128, 256), L=64, r=2, in_ch=4):
    """Raw module-style parameters (stream_bit = [1,1,1,1], fusion='se_fusion')."""
    keys = jax.random.split(key, 16)
    fuse_dim = sum(num_features)
    C = fuse_dim // L
    d = C // r

    params = {"L": L, "num_features": tuple(num_features)}
    # External backbones (glue): GAP over H,W then Linear(in_ch, n_features).
    params["backbones"] = tuple(
        _linear_params(keys[i], in_ch, num_features[i]) for i in range(4))

    # attn = SESeg1D(fuse_dim, r, L)
    params["se_fc1"] = _linear_params(keys[4], C, d)
    params["se_fc2"] = _linear_params(keys[5], d, C)

    # fuse = Linear(fuse_dim, 256) + BatchNorm1d(256) [+ ReLU + Dropout]
    params["fuse_lin"] = _linear_params(keys[6], fuse_dim, 256)
    params["bn"] = (jnp.ones((256,), jnp.float32),    # gamma
                    jnp.zeros((256,), jnp.float32),   # beta
                    jnp.zeros((256,), jnp.float32),   # running mean
                    jnp.ones((256,), jnp.float32))    # running var
    params["fc_cat"] = _linear_params(keys[7], 256, 26)
    params["fc_cont"] = _linear_params(keys[8], 256, 3)
    return params


def fold_params(params):
    """Offline prep: BN folding, head merge+pad, pooling/expansion matrices, bf16 casts."""
    L = params["L"]
    fuse_dim = sum(params["num_features"])
    C = fuse_dim // L

    # Segment pooling / expansion matrices for the lane-dense SE block.
    seg = (jnp.arange(fuse_dim)[:, None] // L) == jnp.arange(C)[None, :]   # (F, C) 0/1
    pool = (seg.astype(jnp.float32) / float(L)).astype(jnp.bfloat16)       # mean over L
    expand = seg.astype(jnp.float32).T.astype(jnp.bfloat16)                # (C, F), 0/1 exact

    w1, b1 = params["se_fc1"]
    w2, b2 = params["se_fc2"]

    # Fold eval-mode BatchNorm into the fuse Linear.
    wf, bf = params["fuse_lin"]
    gamma, beta, rmean, rvar = params["bn"]
    inv = gamma * jax.lax.rsqrt(rvar + 1e-5)
    wf_folded = wf * inv[None, :]
    bf_folded = (bf - rmean) * inv + beta

    # Merge fc_cat | fc_cont into one 128-lane-padded head.
    wcat, bcat = params["fc_cat"]
    wcont, bcont = params["fc_cont"]
    wh = jnp.zeros((256, 128), jnp.float32)
    wh = wh.at[:, :26].set(wcat).at[:, 26:29].set(wcont)
    bh = jnp.zeros((128,), jnp.float32)
    bh = bh.at[:26].set(bcat).at[26:29].set(bcont)

    return {
        "backbones": params["backbones"],
        "pool": pool,                                    # (F, C) bf16
        "w1": w1.astype(jnp.bfloat16), "b1": b1.reshape(1, -1),
        "w2": w2.astype(jnp.bfloat16), "b2": b2.reshape(1, -1),
        "expand": expand,                                # (C, F) bf16 (0/1, exact)
        "wf": wf_folded.astype(jnp.bfloat16), "bf": bf_folded.reshape(1, -1),
        "wh": wh.astype(jnp.bfloat16), "bh": bh.reshape(1, -1),
    }


def _backbone_bf16(x_nchw, lin):
    """Synthetic external backbone: GAP over H,W then Linear; emits bf16 for the kernel."""
    w, b = lin
    pooled = jnp.mean(x_nchw, axis=(2, 3))               # (B, C_in)
    return (pooled @ w + b).astype(jnp.bfloat16)          # (B, n_features) bf16


# --------------------------------------------------------------------------
# Full forward = EmoticMultiStream.forward (stream_bit=[1,1,1,1], eval mode).
# --------------------------------------------------------------------------
@jax.jit
def emotic_multistream(kparams, x_context, x_body, x_face):
    # xs = [x_context, x_body, x_face, x_context]  (caption stream reuses x_context per spec)
    xs = (x_context, x_body, x_face, x_context)
    feats = tuple(_backbone_bf16(xs[i], kparams["backbones"][i]) for i in range(4))
    # No wrapper concat: the four bf16 streams go straight into the fused kernel.
    cat_out, cont_out = _fused_forward(kparams, feats)
    return cat_out, cont_out


# --------------------------------------------------------------------------
# Pure-JAX f32 reference (mirrors the PyTorch forward) for a tolerance check.
# --------------------------------------------------------------------------
def _reference_forward(params, x_context, x_body, x_face):
    xs = (x_context, x_body, x_face, x_context)
    feats = [jnp.mean(xs[i], axis=(2, 3)) @ params["backbones"][i][0]
             + params["backbones"][i][1] for i in range(4)]
    x = jnp.concatenate(feats, axis=1)                    # (B, 768)
    B = x.shape[0]
    L = params["L"]
    C = x.shape[1] // L
    xs_ = x.reshape(B, C, L)
    fea_s = xs_.mean(-1)
    w1, b1 = params["se_fc1"]
    w2, b2 = params["se_fc2"]
    fea_z = jnp.maximum(fea_s @ w1 + b1, 0.0)
    attn = jax.nn.softmax(fea_z @ w2 + b2, axis=1)
    x = (xs_ * attn[:, :, None]).reshape(B, -1)
    wf, bf = params["fuse_lin"]
    gamma, beta, rmean, rvar = params["bn"]
    h = x @ wf + bf
    h = (h - rmean) * gamma * jax.lax.rsqrt(rvar + 1e-5) + beta
    h = jnp.maximum(h, 0.0)
    wcat, bcat = params["fc_cat"]
    wcont, bcont = params["fc_cont"]
    return h @ wcat + bcat, h @ wcont + bcont


if __name__ == "__main__":
    key = jax.random.PRNGKey(0)
    k_in, k_par = jax.random.split(key)
    k_ctx, k_body, k_face = jax.random.split(k_in, 3)

    B = 2
    x_context = jax.random.normal(k_ctx, (B, 4, 16, 16), jnp.float32)
    x_body = jax.random.normal(k_body, (B, 4, 16, 16), jnp.float32)
    x_face = jax.random.normal(k_face, (B, 4, 8, 8), jnp.float32)

    raw_params = make_params(k_par)
    kparams = fold_params(raw_params)   # offline: BN fold, head merge, bf16 casts

    cat_out, cont_out = emotic_multistream(kparams, x_context, x_body, x_face)
    jax.block_until_ready((cat_out, cont_out))
    assert cat_out.shape == (B, 26) and cont_out.shape == (B, 3)

    # Numerical check vs all-f32 reference (bf16 matmul path => loose tolerance).
    ref_cat, ref_cont = _reference_forward(raw_params, x_context, x_body, x_face)
    assert bool(jnp.allclose(cat_out, ref_cat, rtol=5e-2, atol=5e-3)), "cat_out mismatch"
    assert bool(jnp.allclose(cont_out, ref_cont, rtol=5e-2, atol=5e-3)), "cont_out mismatch"

    print("KERNEL_OK")
</pallas_src>

<mosaic_0001>
module attributes {stable_mosaic.version = 11 : i64} {
  func.func @_emotic_fused_kernel(%arg0: i32, %arg1: memref<8x256xbf16, #tpu.memory_space<vmem>>, %arg2: memref<8x128xbf16, #tpu.memory_space<vmem>>, %arg3: memref<8x128xbf16, #tpu.memory_space<vmem>>, %arg4: memref<8x256xbf16, #tpu.memory_space<vmem>>, %arg5: memref<768x12xbf16, #tpu.memory_space<vmem>>, %arg6: memref<12x6xbf16, #tpu.memory_space<vmem>>, %arg7: memref<1x6xf32, #tpu.memory_space<vmem>>, %arg8: memref<6x12xbf16, #tpu.memory_space<vmem>>, %arg9: memref<1x12xf32, #tpu.memory_space<vmem>>, %arg10: memref<12x768xbf16, #tpu.memory_space<vmem>>, %arg11: memref<768x256xbf16, #tpu.memory_space<vmem>>, %arg12: memref<1x256xf32, #tpu.memory_space<vmem>>, %arg13: memref<256x128xbf16, #tpu.memory_space<vmem>>, %arg14: memref<1x128xf32, #tpu.memory_space<vmem>>, %arg15: memref<8x128xf32, #tpu.memory_space<vmem>>) attributes {dimension_semantics = [#tpu.dimension_semantics<parallel>], iteration_bounds = array<i64: 1>, scalar_prefetch = 0 : i64, scratch_operands = 0 : i64, tpu.core_type = #tpu.core_type<tc>, window_params = [{transform_indices = @transform_0, window_bounds = array<i64: 8, 256>}, {transform_indices = @transform_1, window_bounds = array<i64: 8, 128>}, {transform_indices = @transform_2, window_bounds = array<i64: 8, 128>}, {transform_indices = @transform_3, window_bounds = array<i64: 8, 256>}, {pipeline_mode = #tpu.pipeline_mode<synchronous>, transform_indices = @transform_4, window_bounds = array<i64: 768, 12>}, {pipeline_mode = #tpu.pipeline_mode<synchronous>, transform_indices = @transform_5, window_bounds = array<i64: 12, 6>}, {pipeline_mode = #tpu.pipeline_mode<synchronous>, transform_indices = @transform_6, window_bounds = array<i64: 1, 6>}, {pipeline_mode = #tpu.pipeline_mode<synchronous>, transform_indices = @transform_7, window_bounds = array<i64: 6, 12>}, {pipeline_mode = #tpu.pipeline_mode<synchronous>, transform_indices = @transform_8, window_bounds = array<i64: 1, 12>}, {pipeline_mode = #tpu.pipeline_mode<synchronous>, transform_indices = @transform_9, window_bounds = array<i64: 12, 768>}, {pipeline_mode = #tpu.pipeline_mode<synchronous>, transform_indices = @transform_10, window_bounds = array<i64: 768, 256>}, {pipeline_mode = #tpu.pipeline_mode<synchronous>, transform_indices = @transform_11, window_bounds = array<i64: 1, 256>}, {pipeline_mode = #tpu.pipeline_mode<synchronous>, transform_indices = @transform_12, window_bounds = array<i64: 256, 128>}, {pipeline_mode = #tpu.pipeline_mode<synchronous>, transform_indices = @transform_13, window_bounds = array<i64: 1, 128>}, {transform_indices = @transform_14, window_bounds = array<i64: 8, 128>}]} {
    %c0 = arith.constant 0 : index
    %c0_0 = arith.constant 0 : index
    %0 = vector.load %arg1[%c0, %c0_0] : memref<8x256xbf16, #tpu.memory_space<vmem>>, vector<8x256xbf16>
    %c0_1 = arith.constant 0 : index
    %c0_2 = arith.constant 0 : index
    %1 = vector.load %arg2[%c0_1, %c0_2] : memref<8x128xbf16, #tpu.memory_space<vmem>>, vector<8x128xbf16>
    %c0_3 = arith.constant 0 : index
    %c0_4 = arith.constant 0 : index
    %2 = vector.load %arg3[%c0_3, %c0_4] : memref<8x128xbf16, #tpu.memory_space<vmem>>, vector<8x128xbf16>
    %c0_5 = arith.constant 0 : index
    %c0_6 = arith.constant 0 : index
    %3 = vector.load %arg4[%c0_5, %c0_6] : memref<8x256xbf16, #tpu.memory_space<vmem>>, vector<8x256xbf16>
    %4 = tpu.concatenate %0, %1, %2, %3 in 1 : vector<8x256xbf16>, vector<8x128xbf16>, vector<8x128xbf16>, vector<8x256xbf16> -> vector<8x768xbf16>
    %c0_7 = arith.constant 0 : index
    %c0_8 = arith.constant 0 : index
    %5 = vector.load %arg5[%c0_7, %c0_8] : memref<768x12xbf16, #tpu.memory_space<vmem>>, vector<768x12xbf16>
    %cst = arith.constant dense<0.000000e+00> : vector<8x12xf32>
    %6 = tpu.matmul %4, %5, %cst {dimension_numbers = #tpu.dot_dimension_numbers<[1], [0], [0], [1], [0, 0, 1, 1], [], []>} : vector<8x768xbf16>, vector<768x12xbf16>, vector<8x12xf32> -> vector<8x12xf32>
    %7 = arith.truncf %6 : vector<8x12xf32> to vector<8x12xbf16>
    %c0_9 = arith.constant 0 : index
    %c0_10 = arith.constant 0 : index
    %8 = vector.load %arg6[%c0_9, %c0_10] : memref<12x6xbf16, #tpu.memory_space<vmem>>, vector<12x6xbf16>
    %cst_11 = arith.constant dense<0.000000e+00> : vector<8x6xf32>
    %9 = tpu.matmul %7, %8, %cst_11 {dimension_numbers = #tpu.dot_dimension_numbers<[1], [0], [0], [1], [0, 0, 1, 1], [], []>} : vector<8x12xbf16>, vector<12x6xbf16>, vector<8x6xf32> -> vector<8x6xf32>
    %c0_12 = arith.constant 0 : index
    %c0_13 = arith.constant 0 : index
    %10 = vector.load %arg7[%c0_12, %c0_13] : memref<1x6xf32, #tpu.memory_space<vmem>>, vector<1x6xf32>
    %11 = vector.broadcast %10 : vector<1x6xf32> to vector<8x6xf32>
    %12 = arith.addf %9, %11 : vector<8x6xf32>
    %cst_14 = arith.constant 0.000000e+00 : f32
    %13 = vector.broadcast %cst_14 : f32 to vector<8x6xf32>
    %14 = arith.maximumf %12, %13 : vector<8x6xf32>
    %15 = arith.truncf %14 : vector<8x6xf32> to vector<8x6xbf16>
    %c0_15 = arith.constant 0 : index
    %c0_16 = arith.constant 0 : index
    %16 = vector.load %arg8[%c0_15, %c0_16] : memref<6x12xbf16, #tpu.memory_space<vmem>>, vector<6x12xbf16>
    %cst_17 = arith.constant dense<0.000000e+00> : vector<8x12xf32>
    %17 = tpu.matmul %15, %16, %cst_17 {dimension_numbers = #tpu.dot_dimension_numbers<[1], [0], [0], [1], [0, 0, 1, 1], [], []>} : vector<8x6xbf16>, vector<6x12xbf16>, vector<8x12xf32> -> vector<8x12xf32>
    %c0_18 = arith.constant 0 : index
    %c0_19 = arith.constant 0 : index
    %18 = vector.load %arg9[%c0_18, %c0_19] : memref<1x12xf32, #tpu.memory_space<vmem>>, vector<1x12xf32>
    %19 = vector.broadcast %18 : vector<1x12xf32> to vector<8x12xf32>
    %20 = arith.addf %17, %19 : vector<8x12xf32>
    %cst_20 = arith.constant dense<0xFF800000> : vector<8xf32>
    %21 = vector.multi_reduction <maximumf>, %20, %cst_20 [1] : vector<8x12xf32> to vector<8xf32>
    %22 = vector.shape_cast %21 : vector<8xf32> to vector<8x1xf32>
    %23 = vector.broadcast %22 : vector<8x1xf32> to vector<8x12xf32>
    %24 = arith.subf %20, %23 : vector<8x12xf32>
    %25 = math.exp %24 : vector<8x12xf32>
    %cst_21 = arith.constant dense<0.000000e+00> : vector<8xf32>
    %26 = vector.multi_reduction <add>, %25, %cst_21 [1] : vector<8x12xf32> to vector<8xf32>
    %27 = vector.shape_cast %26 : vector<8xf32> to vector<8x1xf32>
    %28 = vector.broadcast %27 : vector<8x1xf32> to vector<8x12xf32>
    %29 = arith.divf %25, %28 : vector<8x12xf32>
    %30 = arith.truncf %29 : vector<8x12xf32> to vector<8x12xbf16>
    %c0_22 = arith.constant 0 : index
    %c0_23 = arith.constant 0 : index
    %31 = vector.load %arg10[%c0_22, %c0_23] : memref<12x768xbf16, #tpu.memory_space<vmem>>, vector<12x768xbf16>
    %cst_24 = arith.constant dense<0.000000e+00> : vector<8x768xf32>
    %32 = tpu.matmul %30, %31, %cst_24 {dimension_numbers = #tpu.dot_dimension_numbers<[1], [0], [0], [1], [0, 0, 1, 1], [], []>} : vector<8x12xbf16>, vector<12x768xbf16>, vector<8x768xf32> -> vector<8x768xf32>
    %33 = arith.extf %4 : vector<8x768xbf16> to vector<8x768xf32>
    %34 = arith.mulf %33, %32 : vector<8x768xf32>
    %35 = arith.truncf %34 : vector<8x768xf32> to vector<8x768xbf16>
    %c0_25 = arith.constant 0 : index
    %c0_26 = arith.constant 0 : index
    %36 = vector.load %arg11[%c0_25, %c0_26] : memref<768x256xbf16, #tpu.memory_space<vmem>>, vector<768x256xbf16>
    %cst_27 = arith.constant dense<0.000000e+00> : vector<8x256xf32>
    %37 = tpu.matmul %35, %36, %cst_27 {dimension_numbers = #tpu.dot_dimension_numbers<[1], [0], [0], [1], [0, 0, 1, 1], [], []>} : vector<8x768xbf16>, vector<768x256xbf16>, vector<8x256xf32> -> vector<8x256xf32>
    %c0_28 = arith.constant 0 : index
    %c0_29 = arith.constant 0 : index
    %38 = vector.load %arg12[%c0_28, %c0_29] : memref<1x256xf32, #tpu.memory_space<vmem>>, vector<1x256xf32>
    %39 = vector.broadcast %38 : vector<1x256xf32> to vector<8x256xf32>
    %40 = arith.addf %37, %39 : vector<8x256xf32>
    %cst_30 = arith.constant 0.000000e+00 : f32
    %41 = vector.broadcast %cst_30 : f32 to vector<8x256xf32>
    %42 = arith.maximumf %40, %41 : vector<8x256xf32>
    %43 = arith.truncf %42 : vector<8x256xf32> to vector<8x256xbf16>
    %c0_31 = arith.constant 0 : index
    %c0_32 = arith.constant 0 : index
    %44 = vector.load %arg13[%c0_31, %c0_32] : memref<256x128xbf16, #tpu.memory_space<vmem>>, vector<256x128xbf16>
    %cst_33 = arith.constant dense<0.000000e+00> : vector<8x128xf32>
    %45 = tpu.matmul %43, %44, %cst_33 {dimension_numbers = #tpu.dot_dimension_numbers<[1], [0], [0], [1], [0, 0, 1, 1], [], []>} : vector<8x256xbf16>, vector<256x128xbf16>, vector<8x128xf32> -> vector<8x128xf32>
    %c0_34 = arith.constant 0 : index
    %c0_35 = arith.constant 0 : index
    %46 = vector.load %arg14[%c0_34, %c0_35] : memref<1x128xf32, #tpu.memory_space<vmem>>, vector<1x128xf32>
    %47 = vector.broadcast %46 : vector<1x128xf32> to vector<8x128xf32>
    %48 = arith.addf %45, %47 : vector<8x128xf32>
    %c0_36 = arith.constant 0 : index
    %c0_37 = arith.constant 0 : index
    %49 = vector.load %arg15[%c0_36, %c0_37] : memref<8x128xf32, #tpu.memory_space<vmem>>, vector<8x128xf32>
    tpu.vector_store %arg15[%c0_36, %c0_37], %48 {strides = array<i32>} : memref<8x128xf32, #tpu.memory_space<vmem>>, vector<8x128xf32>,
    return
  }
  func.func @transform_0(%arg0: i32) -> (i32, i32) {
    %c0_i32 = arith.constant 0 : i32
    %c0_i32_0 = arith.constant 0 : i32
    return %arg0, %c0_i32 : i32, i32
  }
  func.func @transform_1(%arg0: i32) -> (i32, i32) {
    %c0_i32 = arith.constant 0 : i32
    %c0_i32_0 = arith.constant 0 : i32
    return %arg0, %c0_i32 : i32, i32
  }
  func.func @transform_2(%arg0: i32) -> (i32, i32) {
    %c0_i32 = arith.constant 0 : i32
    %c0_i32_0 = arith.constant 0 : i32
    return %arg0, %c0_i32 : i32, i32
  }
  func.func @transform_3(%arg0: i32) -> (i32, i32) {
    %c0_i32 = arith.constant 0 : i32
    %c0_i32_0 = arith.constant 0 : i32
    return %arg0, %c0_i32 : i32, i32
  }
  func.func @transform_4(%arg0: i32) -> (i32, i32) {
    %c0_i32 = arith.constant 0 : i32
    %c0_i32_0 = arith.constant 0 : i32
    %c0_i32_1 = arith.constant 0 : i32
    return %c0_i32, %c0_i32_0 : i32, i32
  }
  func.func @transform_5(%arg0: i32) -> (i32, i32) {
    %c0_i32 = arith.constant 0 : i32
    %c0_i32_0 = arith.constant 0 : i32
    %c0_i32_1 = arith.constant 0 : i32
    return %c0_i32, %c0_i32_0 : i32, i32
  }
  func.func @transform_6(%arg0: i32) -> (i32, i32) {
    %c0_i32 = arith.constant 0 : i32
    %c0_i32_0 = arith.constant 0 : i32
    %c0_i32_1 = arith.constant 0 : i32
    return %c0_i32, %c0_i32_0 : i32, i32
  }
  func.func @transform_7(%arg0: i32) -> (i32, i32) {
    %c0_i32 = arith.constant 0 : i32
    %c0_i32_0 = arith.constant 0 : i32
    %c0_i32_1 = arith.constant 0 : i32
    return %c0_i32, %c0_i32_0 : i32, i32
  }
  func.func @transform_8(%arg0: i32) -> (i32, i32) {
    %c0_i32 = arith.constant 0 : i32
    %c0_i32_0 = arith.constant 0 : i32
    %c0_i32_1 = arith.constant 0 : i32
    return %c0_i32, %c0_i32_0 : i32, i32
  }
  func.func @transform_9(%arg0: i32) -> (i32, i32) {
    %c0_i32 = arith.constant 0 : i32
    %c0_i32_0 = arith.constant 0 : i32
    %c0_i32_1 = arith.constant 0 : i32
    return %c0_i32, %c0_i32_0 : i32, i32
  }
  func.func @transform_10(%arg0: i32) -> (i32, i32) {
    %c0_i32 = arith.constant 0 : i32
    %c0_i32_0 = arith.constant 0 : i32
    %c0_i32_1 = arith.constant 0 : i32
    return %c0_i32, %c0_i32_0 : i32, i32
  }
  func.func @transform_11(%arg0: i32) -> (i32, i32) {
    %c0_i32 = arith.constant 0 : i32
    %c0_i32_0 = arith.constant 0 : i32
    %c0_i32_1 = arith.constant 0 : i32
    return %c0_i32, %c0_i32_0 : i32, i32
  }
  func.func @transform_12(%arg0: i32) -> (i32, i32) {
    %c0_i32 = arith.constant 0 : i32
    %c0_i32_0 = arith.constant 0 : i32
    %c0_i32_1 = arith.constant 0 : i32
    return %c0_i32, %c0_i32_0 : i32, i32
  }
  func.func @transform_13(%arg0: i32) -> (i32, i32) {
    %c0_i32 = arith.constant 0 : i32
    %c0_i32_0 = arith.constant 0 : i32
    %c0_i32_1 = arith.constant 0 : i32
    return %c0_i32, %c0_i32_0 : i32, i32
  }
  func.func @transform_14(%arg0: i32) -> (i32, i32) {
    %c0_i32 = arith.constant 0 : i32
    %c0_i32_0 = arith.constant 0 : i32
    return %arg0, %c0_i32 : i32, i32
  }
}

</mosaic_0001>

<bundles_post_ra>
// kernel: emotic_multistream.1
= control target key start
LH: loop header
LB: loop body
LE: loop exit
PB: predicated region body
PF: predicated region fallthrough
CT: control target
= control target key end

     0   :  { %19 = vsyncpa [#allocation3], 0  ;;  %s2562_s16 = smov [#allocation2]   ;;  %s2563_s18 = smov 128   ;;  %s2971_s0 = inlined_call_operand.vmem [shape: bf16[8,256], index: 0, kind: input, shape index: {}]   ;;  %s2972_s1 = inlined_call_operand.vmem [shape: bf16[8,128], index: 1, kind: input, shape index: {}]   ;;  %s2973_s2 = inlined_call_operand.vmem [shape: bf16[8,128], index: 2, kind: input, shape index: {}]   ;;  %s2974_s3 = inlined_call_operand.vmem [shape: bf16[8,256], index: 3, kind: input, shape index: {}]   ;;  %s2975_s4 = inlined_call_operand.vmem [shape: bf16[768,12], index: 4, kind: input, shape index: {}]   ;;  %s2976_s5 = inlined_call_operand.vmem [shape: bf16[12,6], index: 5, kind: input, shape index: {}]   ;;  %s2977_s6 = inlined_call_operand.vmem [shape: f32[1,6], index: 6, kind: input, shape index: {}]   ;;  %s2978_s7 = inlined_call_operand.vmem [shape: bf16[6,12], index: 7, kind: input, shape index: {}]   ;;  %s2979_s8 = inlined_call_operand.vmem [shape: f32[1,12], index: 8, kind: input, shape index: {}]   ;;  %s2980_s9 = inlined_call_operand.vmem [shape: bf16[12,768], index: 9, kind: input, shape index: {}]   ;;  %s2981_s10 = inlined_call_operand.hbm [shape: bf16[768,256], index: 10, kind: input, shape index: {}]   ;;  %s2982_s11 = inlined_call_operand.vmem [shape: f32[1,256], index: 11, kind: input, shape index: {}]   ;;  %s2983_s12 = inlined_call_operand.vmem [shape: bf16[256,128], index: 12, kind: input, shape index: {}]   ;;  %s2984_s13 = inlined_call_operand.vmem [shape: f32[1,128], index: 13, kind: input, shape index: {}]   ;;  %s2985_s14 = inlined_call_operand.vmem [shape: f32[8,128], index: 14, kind: output, shape index: {}]  }
   0x1   :  { %s44_s15 = sshll.u32 %s2981_s10, 4  ;;  %s46_s17 = sshll.u32 %s2562_s16, 4  ;;  %s45_s15 = int_to_ptr.hbm [resolvable:$true] %s44_s15  ;;  %s47_s17 = int_to_ptr.vmem [resolvable:$true] %s46_s17 }
   0x2   :  { %s2564_s19 = smov 8  }
   0x3   :  { %52 = dma.hbm_to_vmem [thread:$0]  %s45_s15, 12288, %s47_s17, [#allocation3], %s2563_s18, %s2563_s18, %s2564_s19  }
   0x4   :  { %2560 = dma.done.wait [#allocation3], 12288  }
   0x5   :  { %2561 = vsyncadd [#allocation3], 4294955008  ;;  %v2366_v0 = vld [vmem:[%s2975_s4 + $0x38] sm:$0xff]  ;;  %v2365_v2 = vld [vmem:[%s2975_s4 + $0x30] sm:$0xff]  ;;  %vm560_vm0 = vcmask 1045504   ;;  %vm588_vm1 = vcmask 1042432  }
   0x6   :  { %v2374_v1 = vld [vmem:[%s2975_s4 + $0x78] sm:$0xff]  ;;  %466 = vmatpush.bf16.msra.mxu0 %v2366_v0  ;;  %v2373_v3 = vld [vmem:[%s2975_s4 + $0x70] sm:$0xff]  ;;  %v2364_v8 = vld [vmem:[%s2975_s4 + $0x28] sm:$0xff]  ;;  %vm556_vm2 = vcmask 97280   ;;  %vm584_vm3 = vcmask 48128  }
   0x7   :  { %479 = vmatpush.bf16.msra.mxu1 %v2374_v1  ;;  %v2382_v4 = vld [vmem:[%s2975_s4 + $0xb8] sm:$0xff]  ;;  %v2381_v6 = vld [vmem:[%s2975_s4 + $0xb0] sm:$0xff]  ;;  %v2372_v9 = vld [vmem:[%s2975_s4 + $0x68] sm:$0xff] }
   0x8   :  { %v2390_v5 = vld [vmem:[%s2975_s4 + $0xf8] sm:$0xff]  ;;  %492 = vmatpush.bf16.msra.mxu2 %v2382_v4  ;;  %v2389_v7 = vld [vmem:[%s2975_s4 + $0xf0] sm:$0xff]  ;;  %v2380_v10 = vld [vmem:[%s2975_s4 + $0xa8] sm:$0xff] }
   0x9   :  { %505 = vmatpush.bf16.msra.mxu3 %v2390_v5  ;;  %v2388_v11 = vld [vmem:[%s2975_s4 + $0xe8] sm:$0xff]  ;;  %v2363_v12 = vld [vmem:[%s2975_s4 + $0x20] sm:$0xff]  ;;  %v2362_v16 = vld [vmem:[%s2975_s4 + $0x18] sm:$0xff] }
   0xa   :  { %467 = vmatpush.bf16.msra.mxu0 %v2365_v2  ;;  %v2371_v13 = vld [vmem:[%s2975_s4 + $0x60] sm:$0xff]  ;;  %v2370_v17 = vld [vmem:[%s2975_s4 + $0x58] sm:$0xff]  ;;  %v2361_v20 = vld [vmem:[%s2975_s4 + $0x10] sm:$0xff] }
   0xb   :  { %480 = vmatpush.bf16.msra.mxu1 %v2373_v3  ;;  %v2379_v14 = vld [vmem:[%s2975_s4 + $0xa0] sm:$0xff]  ;;  %v2378_v18 = vld [vmem:[%s2975_s4 + $0x98] sm:$0xff]  ;;  %v2369_v21 = vld [vmem:[%s2975_s4 + $0x50] sm:$0xff] }
   0xc   :  { %493 = vmatpush.bf16.msra.mxu2 %v2381_v6  ;;  %v2387_v15 = vld [vmem:[%s2975_s4 + $0xe0] sm:$0xff]  ;;  %v2386_v19 = vld [vmem:[%s2975_s4 + $0xd8] sm:$0xff]  ;;  %v2377_v22 = vld [vmem:[%s2975_s4 + $0x90] sm:$0xff] }
   0xd   :  { %506 = vmatpush.bf16.msra.mxu3 %v2389_v7  ;;  %v2385_v23 = vld [vmem:[%s2975_s4 + $0xd0] sm:$0xff]  ;;  %v2360_v24 = vld [vmem:[%s2975_s4 + $0x8] sm:$0xff]  ;;  %v64_v26 = vld [vmem:[%s2971_s0] sm:$0xff] }
   0xe   :  { %468 = vmatpush.bf16.msra.mxu0 %v2364_v8  ;;  %v2368_v25 = vld [vmem:[%s2975_s4 + $0x48] sm:$0xff]  ;;  %v69_v29 = vunpack.c.l.b16 %v64_v26  ;;  %v70_v30 = vunpack.c.h.b16 %v64_v26  ;;  %v2359_v31 = vld [vmem:[%s2975_s4] sm:$0xff]  ;;  %v2398_v33 = vld [vmem:[%s2975_s4 + $0x138] sm:$0xff] }
   0xf   :  { %481 = vmatpush.bf16.msra.mxu1 %v2372_v9  ;;  %v2376_v27 = vld [vmem:[%s2975_s4 + $0x88] sm:$0xff]  ;;  %v2367_v32 = vld [vmem:[%s2975_s4 + $0x40] sm:$0xff]  ;;  %v2406_v34 = vld [vmem:[%s2975_s4 + $0x178] sm:$0xff] }
  0x10   :  { %494 = vmatpush.bf16.msra.mxu2 %v2380_v10  ;;  %v2384_v28 = vld [vmem:[%s2975_s4 + $0xc8] sm:$0xff]  ;;  %v2375_v35 = vld [vmem:[%s2975_s4 + $0x80] sm:$0xff]  ;;  %v2748_v37 = vpack.c.b16 %v69_v29, %v69_v29  ;;  %v2750_v38 = vpack.c.b16 %v70_v30, %v70_v30  ;;  %v2397_v39 = vld [vmem:[%s2975_s4 + $0x130] sm:$0xff] }
  0x11   :  { %507 = vmatpush.bf16.msra.mxu3 %v2388_v11  ;;  %v2383_v36 = vld [vmem:[%s2975_s4 + $0xc0] sm:$0xff]  ;;  %v2405_v40 = vld [vmem:[%s2975_s4 + $0x170] sm:$0xff]  ;;  %v2396_v43 = vld [vmem:[%s2975_s4 + $0x128] sm:$0xff] }
  0x12   :  { %469 = vmatpush.bf16.msra.mxu0 %v2363_v12  ;;  %v2763_v41 = vld [vmem:[%s2972_s1] sm:$0xf]  ;;  %v2404_v44 = vld [vmem:[%s2975_s4 + $0x168] sm:$0xff]  ;;  %v2394_v47 = vld [vmem:[%s2975_s4 + $0x118] sm:$0xff] }
  0x13   :  { %482 = vmatpush.bf16.msra.mxu1 %v2371_v13  ;;  %v2768_v42 = vld [vmem:[%s2973_s2] sm:$0xf]  ;;  %v2402_v48 = vld [vmem:[%s2975_s4 + $0x158] sm:$0xff]  ;;  %v2393_v49 = vld [vmem:[%s2975_s4 + $0x110] sm:$0xff] }
  0x14   :  { %495 = vmatpush.bf16.msra.mxu2 %v2379_v14  ;;  %v2395_v45 = vld [vmem:[%s2975_s4 + $0x120] sm:$0xff]  ;;  %v2401_v50 = vld [vmem:[%s2975_s4 + $0x150] sm:$0xff]  ;;  %v2392_v51 = vld [vmem:[%s2975_s4 + $0x108] sm:$0xff] }
  0x15   :  { %508 = vmatpush.bf16.msra.mxu3 %v2387_v15  ;;  %v2403_v46 = vld [vmem:[%s2975_s4 + $0x160] sm:$0xff]  ;;  %v2400_v52 = vld [vmem:[%s2975_s4 + $0x148] sm:$0xff] }
  0x16   :  { %470 = vmatpush.bf16.msra.mxu0 %v2362_v16  ;;  %v67_v53 = vld [vmem:[%s2974_s3] sm:$0xff] }
  0x17   :  { %483 = vmatpush.bf16.msra.mxu1 %v2370_v17  ;;  %v76_v54 = vunpack.c.l.b16 %v67_v53  ;;  %v77_v55 = vunpack.c.h.b16 %v67_v53  ;;  %v2391_v56 = vld [vmem:[%s2975_s4 + $0x100] sm:$0xff] }
  0x18   :  { %496 = vmatpush.bf16.msra.mxu2 %v2378_v18  ;;  %v2399_v57 = vld [vmem:[%s2975_s4 + $0x140] sm:$0xff] }
  0x19   :  { %509 = vmatpush.bf16.msra.mxu3 %v2386_v19  ;;  %v2811_v58 = vpack.c.b16 %v76_v54, %v76_v54  ;;  %v2813_v59 = vpack.c.b16 %v77_v55, %v77_v55  ;;  %v1877_v60 = vld [vmem:[%s2976_s5] sm:$0xf]  ;;  %v2407_v61 = vld [vmem:[%s2976_s5] sm:$0x30] }
  0x1a   :  { %471 = vmatpush.bf16.msra.mxu0 %v2361_v20  ;;  %v1878_v62 = vor.u32 %v2407_v61, %v1877_v60  ;;  %v579_v2 = vld [vmem:[%s2978_s7] sm:$0x7] }
  0x1b   :  { %484 = vmatpush.bf16.msra.mxu1 %v2369_v21  ;;  %v590_v3 = vsel %vm588_vm1, %v579_v2, 0  ;;  %v2529_v20 = vld [vmem:[%s2977_s6] ss:$0 sm:$0xff]  ;;  %v2413_v2 = vld [vmem:[%s2980_s9 + $0x24] sm:$0x30] }
  0x1c   :  { %497 = vmatpush.bf16.msra.mxu2 %v2377_v22  ;;  %v562_v63 = vsel %vm560_vm0, %v1878_v62, 0  ;;  %v2530_v26 = vld [vmem:[%s2979_s8] ss:$0 sm:$0xff] }
  0x1d   :  { %510 = vmatpush.bf16.msra.mxu3 %v2385_v23 }
  0x1e   :  { %472 = vmatpush.bf16.msra.mxu0 %v2360_v24 }
  0x1f   :  { %485 = vmatpush.bf16.msra.mxu1 %v2368_v25 }
  0x20   :  { %498 = vmatpush.bf16.msra.mxu2 %v2376_v27 }
  0x21   :  { %511 = vmatpush.bf16.msra.mxu3 %v2384_v28 }
  0x22   :  { %473 = vmatpush.bf16.msra.mxu0 %v2359_v31 }
  0x23   :  { %486 = vmatpush.bf16.msra.mxu1 %v2367_v32 }
  0x24   :  { %499 = vmatpush.bf16.msra.mxu2 %v2375_v35 }
  0x25   :  { %512 = vmatpush.bf16.msra.mxu3 %v2383_v36  ;;  %474 = vmatmul.bf16.vlgmr.msra.gmra.mxu0 %v2748_v37  ;;  %v1883_v36 = vld [vmem:[%s2980_s9] sm:$0xf] }
  0x26   :  { %518 = vmatpush.bf16.msrb.mxu0 %v2398_v33  ;;  %487 = vmatmul.bf16.vlgmr.msra.gmra.mxu1 %v2750_v38 }
  0x27   :  { %531 = vmatpush.bf16.msrb.mxu1 %v2406_v34  ;;  %500 = vmatmul.bf16.vlgmr.msra.gmra.mxu2 %v2763_v41 }
  0x28   :  { %513 = vmatmul.bf16.vlgmr.msra.gmra.mxu3 %v2768_v42  ;;  %571 = vmatpush.bf16.msrb.mxu2 %v562_v63 }
  0x29   :  { %599 = vmatpush.bf16.msrb.mxu3 %v590_v3  ;;  %v2410_v3 = vld [vmem:[%s2980_s9 + $0x14] sm:$0xf] }
  0x2a   :  { %519 = vmatpush.bf16.msrb.mxu0 %v2397_v39  ;;  %v2411_v39 = vld [vmem:[%s2980_s9 + $0x14] sm:$0x30] }
  0x2b   :  { %532 = vmatpush.bf16.msrb.mxu1 %v2405_v40  ;;  %v2408_v40 = vld [vmem:[%s2980_s9 + $0x4] sm:$0xf] }
  0x2e   :  { %520 = vmatpush.bf16.msrb.mxu0 %v2396_v43  ;;  %v1884_v43 = vor.u32 %v2411_v39, %v1883_v36  ;;  %v2461_v36 = vld [vmem:[#allocation2 + $0x174] sm:$0xf0]  ;;  %v2161_v39 = vld [vmem:[#allocation2 + $0x1f0] sm:$0xf] }
  0x2f   :  { %533 = vmatpush.bf16.msrb.mxu1 %v2404_v44  ;;  %v1885_v44 = vld [vmem:[%s2980_s9 + $0x18] sm:$0x30] }
  0x32   :  { %521 = vmatpush.bf16.msrb.mxu0 %v2395_v45  ;;  %v1888_v45 = vor.u32 %v2408_v40, %v1885_v44  ;;  %v2477_v40 = vld [vmem:[#allocation2 + $0x1f4] sm:$0xf0]  ;;  %v2009_v44 = vld [vmem:[#allocation2 + $0xc0] sm:$0xf] }
  0x33   :  { %534 = vmatpush.bf16.msrb.mxu1 %v2403_v46  ;;  %v664_v46 = vsel %vm560_vm0, %v1884_v43, 0 }
  0x34   :  { %688 = vmatpush.bf16.msra.mxu2 %v664_v46  ;;  %v1937_v46 = vld [vmem:[#allocation2 + $0x30] sm:$0xf] }
  0x36   :  { %522 = vmatpush.bf16.msrb.mxu0 %v2394_v47  ;;  %v667_v47 = vsel %vm560_vm0, %v1888_v45, 0  ;;  %v2439_v45 = vld [vmem:[#allocation2 + $0xc4] sm:$0xf0] }
  0x37   :  { %535 = vmatpush.bf16.msrb.mxu1 %v2402_v48  ;;  %701 = vmatpush.bf16.msra.mxu3 %v667_v47  ;;  %v1891_v48 = vld [vmem:[%s2980_s9 + $0x8] sm:$0xf]  ;;  %v2421_v47 = vld [vmem:[#allocation2 + $0x34] sm:$0xf0] }
  0x3a   :  { %523 = vmatpush.bf16.msrb.mxu0 %v2393_v49  ;;  %v2412_v49 = vld [vmem:[%s2980_s9 + $0x1c] sm:$0x30] }
  0x3b   :  { %536 = vmatpush.bf16.msrb.mxu1 %v2401_v50  ;;  %v2409_v50 = vld [vmem:[%s2980_s9 + $0xc] sm:$0xf] }
  0x3e   :  { %524 = vmatpush.bf16.msrb.mxu0 %v2392_v51  ;;  %v1892_v51 = vor.u32 %v2412_v49, %v1891_v48  ;;  %v2162_v49 = vor.u32 %v2477_v40, %v2161_v39 }
  0x3f   :  { %537 = vmatpush.bf16.msrb.mxu1 %v2400_v52  ;;  %v1893_v52 = vld [vmem:[%s2980_s9 + $0x20] sm:$0x30] }
  0x40   :  { %v1896_v53 = vor.u32 %v2409_v50, %v1893_v52  ;;  %v670_v54 = vsel %vm560_vm0, %v1892_v51, 0  ;;  %v2089_v50 = vld [vmem:[#allocation2 + $0x160] sm:$0xf]  ;;  %v2459_v51 = vld [vmem:[#allocation2 + $0x164] sm:$0xf0] }
  0x41   :  { %v2153_v52 = vld [vmem:[#allocation2 + $0x1e0] sm:$0xf] }
  0x42   :  { %525 = vmatpush.bf16.msrb.mxu0 %v2391_v56  ;;  %v673_v55 = vsel %vm560_vm0, %v1896_v53, 0  ;;  %v2475_v53 = vld [vmem:[#allocation2 + $0x1e4] sm:$0xf0] }
  0x43   :  { %538 = vmatpush.bf16.msrb.mxu1 %v2399_v57 }
  0x45   :  { %526 = vmatmul.bf16.vlgmr.msrb.gmra.mxu0 %v2811_v58 }
  0x46   :  { %539 = vmatmul.bf16.vlgmr.msrb.gmra.mxu1 %v2813_v59 }
  0xa2   :  { %v475_v0 = vpop.f32.mrf.mxu0 }
  0xa3   :  { %v488_v1 = vpop.f32.mrf.mxu1 }
  0xa4   :  { %v489_v10 = vadd.f32 %v488_v1, %v475_v0  ;;  %v1899_v1 = vld [vmem:[%s2980_s9 + $0x10] sm:$0xf] }
  0xaa   :  { %v477_v4 = vpop.f32.mrf.mxu0  ;;  %v501_v6 = vpop.f32.mrf.mxu2 }
  0xab   :  { %v490_v5 = vpop.f32.mrf.mxu1  ;;  %v514_v7 = vpop.f32.mrf.mxu3  ;;  %v502_v11 = vadd.f32 %v501_v6, %v489_v10  ;;  %v1901_v4 = vld [vmem:[%s2980_s9 + $0x28] sm:$0x30] }
  0xad   :  { %v515_v12 = vadd.f32 %v514_v7, %v502_v11 }
  0xb2   :  { %v503_v8 = vpop.f32.mrf.mxu2 }
  0xb3   :  { %v516_v9 = vpop.f32.mrf.mxu3  ;;  %v1900_v8 = vor.u32 %v2413_v2, %v1899_v1  ;;  %v2457_v1 = vld [vmem:[#allocation2 + $0x154] sm:$0xf0]  ;;  %v2145_v2 = vld [vmem:[#allocation2 + $0x1d0] sm:$0xf] }
  0xb4   :  { %v1904_v9 = vor.u32 %v2410_v3, %v1901_v4  ;;  %v2473_v3 = vld [vmem:[#allocation2 + $0x1d4] sm:$0xf0] }
  0xc2   :  { %v527_v13 = vpop.f32.mrf.mxu0 }
  0xc3   :  { %v540_v14 = vpop.f32.mrf.mxu1  ;;  %v528_v15 = vadd.f32 %v527_v13, %v515_v12  ;;  %v676_v13 = vsel %vm560_vm0, %v1900_v8, 0  ;;  %v1921_v8 = vld [vmem:[#allocation2 + $0x10] sm:$0xf] }
  0xc5   :  { %v541_v16 = vadd.f32 %v540_v14, %v528_v15  ;;  %v679_v14 = vsel %vm560_vm0, %v1904_v9, 0  ;;  %v1969_v15 = vld [vmem:[#allocation2 + $0x70] sm:$0xf]  ;;  %v2417_v9 = vld [vmem:[#allocation2 + $0x14] sm:$0xf0] }
  0xc7   :  { %v544_v17 = vpack.c.bf16 %v541_v16, %v541_v16  ;;  %v2429_v16 = vld [vmem:[#allocation2 + $0x74] sm:$0xf0] }
  0xc9   :  { %1879 = vmatmul.msk.bf16.vlgmr.msrb.gmra.mxu2 %vm556_vm2, %v544_v17  ;;  %v2033_v17 = vld [vmem:[#allocation2 + $0xf0] sm:$0xf] }
  0xca   :  { %v529_v18 = vpop.f32.mrf.mxu0  ;;  %714 = vmatpush.bf16.msrb.mxu2 %v670_v54  ;;  %v2010_v54 = vor.u32 %v2439_v45, %v2009_v44  ;;  %v2451_v44 = vld [vmem:[#allocation2 + $0x124] sm:$0xf0]  ;;  %v2121_v45 = vld [vmem:[#allocation2 + $0x1a0] sm:$0xf] }
  0xcb   :  { %v542_v19 = vpop.f32.mrf.mxu1  ;;  %v1970_v18 = vor.u32 %v2429_v16, %v1969_v15  ;;  %v2137_v15 = vld [vmem:[#allocation2 + $0x1c0] sm:$0xf]  ;;  %v2471_v16 = vld [vmem:[#allocation2 + $0x1c4] sm:$0xf0] }
  0xcc   :  { %v2445_v19 = vld [vmem:[#allocation2 + $0xf4] sm:$0xf0] }
  0xcd   :  { %1359 = vmatpush.bf16.msra.mxu0 %v1970_v18  ;;  %v1922_v18 = vor.u32 %v2417_v9, %v1921_v8  ;;  %v2035_v8 = vld [vmem:[#allocation2 + $0xf8] sm:$0xf0] }
 0x14c   :  { %v573_v21 = vpop.f32.mrf.mxu2 }
 0x14d   :  { %v574_v22 = vadd.f32 %v2529_v20, %v573_v21  ;;  %v2034_v20 = vor.u32 %v2445_v19, %v2033_v17  ;;  %v1961_v21 = vld [vmem:[#allocation2 + $0x60] sm:$0xf]  ;;  %v1985_v19 = vld [vmem:[#allocation2 + $0x90] sm:$0xf] }
 0x14f   :  { %v577_v23 = vmax.f32 %v574_v22, 0.0  ;;  %v2427_v22 = vld [vmem:[#allocation2 + $0x64] sm:$0xf0]  ;;  %1372 = vmatpush.bf16.msra.mxu1 %v2034_v20  ;;  %v2433_v20 = vld [vmem:[#allocation2 + $0x94] sm:$0xf0] }
 0x151   :  { %v578_v24 = vpack.c.bf16 %v577_v23, %v577_v23  ;;  %v2025_v23 = vld [vmem:[#allocation2 + $0xe0] sm:$0xf] }
 0x153   :  { %1880 = vmatmul.msk.bf16.vlgmr.msrb.gmra.mxu3 %vm584_vm3, %v578_v24  ;;  %v2443_v24 = vld [vmem:[#allocation2 + $0xe4] sm:$0xf0] }
 0x154   :  { %v575_v25 = vpop.f32.mrf.mxu2  ;;  %727 = vmatpush.bf16.msrb.mxu3 %v673_v55  ;;  %v1938_v55 = vor.u32 %v2421_v47, %v1937_v46  ;;  %v2467_v46 = vld [vmem:[#allocation2 + $0x1a4] sm:$0xf0] }
 0x155   :  { %v1962_v25 = vor.u32 %v2427_v22, %v1961_v21  ;;  %v1913_v21 = vld [vmem:[#allocation2] sm:$0xf]  ;;  %v2415_v22 = vld [vmem:[#allocation2 + $0x4] sm:$0xf0] }
 0x157   :  { %1360 = vmatpush.bf16.msra.mxu0 %v1962_v25  ;;  %v2065_v25 = vld [vmem:[#allocation2 + $0x130] sm:$0xf] }
 0x1d6   :  { %v601_v27 = vpop.f32.mrf.mxu3 }
 0x1d7   :  { %v602_v28 = vadd.f32 %v2530_v26, %v601_v27  ;;  %v2026_v26 = vor.u32 %v2443_v24, %v2025_v23  ;;  %v1953_v27 = vld [vmem:[#allocation2 + $0x50] sm:$0xf]  ;;  %v2138_v24 = vor.u32 %v2471_v16, %v2137_v15  ;;  %v1963_v15 = vld [vmem:[#allocation2 + $0x68] sm:$0xf0]  ;;  %v2442_v16 = vld [vmem:[#allocation2 + $0xe4] sm:$0xf] }
 0x1d9   :  { %v605_v29 = vsel %vm556_vm2, %v602_v28, -inf  ;;  %1373 = vmatpush.bf16.msra.mxu1 %v2026_v26  ;;  %v2453_v26 = vld [vmem:[#allocation2 + $0x134] sm:$0xf0] }
 0x1da   :  { %606 = vmax.xlane.f32.xlu0 %v605_v29  ;;  %v2017_v29 = vld [vmem:[#allocation2 + $0xd0] sm:$0xf]  ;;  %v2066_v39 = vor.u32 %v2453_v26, %v2065_v25  ;;  %v2424_v25 = vld [vmem:[#allocation2 + $0x54] sm:$0xf]  ;;  %v1955_v26 = vld [vmem:[#allocation2 + $0x58] sm:$0xf0] }
 0x1de   :  { %v603_v30 = vpop.f32.mrf.mxu3 }
 0x1df   :  { %v2441_v30 = vld [vmem:[#allocation2 + $0xd4] sm:$0xf0] }
 0x24d   :  { %v607_v31 = vpop.xlane.xlu0 %606 }
 0x24e   :  { %v608_v32 = vsub.f32 %v602_v28, %v607_v31  ;;  %v2425_v28 = vld [vmem:[#allocation2 + $0x54] sm:$0xf0] }
 0x24f   :  { %v1954_v31 = vor.u32 %v2425_v28, %v1953_v27  ;;  %v2129_v27 = vld [vmem:[#allocation2 + $0x1b0] sm:$0xf]  ;;  %v2469_v28 = vld [vmem:[#allocation2 + $0x1b4] sm:$0xf0] }
 0x250   :  { %v609_v33 = vmul.f32 1.442695, %v608_v32  ;;  %v2018_v32 = vor.u32 %v2441_v30, %v2017_v29  ;;  %v1986_v29 = vor.u32 %v2433_v20, %v1985_v19  ;;  %v1977_v30 = vld [vmem:[#allocation2 + $0x80] sm:$0xf]  ;;  %v2130_v40 = vor.u32 %v2469_v28, %v2129_v27  ;;  %v2209_v20 = vld [vmem:[#allocation2 + $0x250] sm:$0xf] }
 0x251   :  { %1361 = vmatpush.bf16.msra.mxu0 %v1954_v31  ;;  %v1914_v31 = vor.u32 %v2415_v22, %v1913_v21  ;;  %v2489_v21 = vld [vmem:[#allocation2 + $0x254] sm:$0xf0]  ;;  %v2273_v22 = vld [vmem:[#allocation2 + $0x2d0] sm:$0xf]  ;;  %v1958_v28 = vor.u32 %v2424_v25, %v1955_v26  ;;  %v2495_v26 = vld [vmem:[#allocation2 + $0x284] sm:$0xf0] }
 0x252   :  { %2532 = vpow2.f32 %v609_v33  ;;  %v1945_v33 = vld [vmem:[#allocation2 + $0x40] sm:$0xf]  ;;  %1374 = vmatpush.bf16.msra.mxu1 %v2018_v32  ;;  %v2431_v32 = vld [vmem:[#allocation2 + $0x84] sm:$0xf0] }
 0x253   :  { %v1978_v47 = vor.u32 %v2431_v32, %v1977_v30  ;;  %v2019_v30 = vld [vmem:[#allocation2 + $0xd8] sm:$0xf0]  ;;  %v2201_v32 = vld [vmem:[#allocation2 + $0x240] sm:$0xf] }
 0x256   :  { %1375 = vmatpush.bf16.msra.mxu1 %v2010_v54 }
 0x258   :  { %v2533_v34 = vpop.eup %2532 }
 0x259   :  { %v611_v35 = vsel %vm556_vm2, %v2533_v34, 0.0 }
 0x25a   :  { %612 = vadd.xlane.f32.xlu0 %v611_v35  ;;  %v2097_v35 = vld [vmem:[#allocation2 + $0x170] sm:$0xf] }
 0x25b   :  { %v2098_v48 = vor.u32 %v2461_v36, %v2097_v35  ;;  %v2289_v35 = vld [vmem:[#allocation2 + $0x2f0] sm:$0xf]  ;;  %v2509_v36 = vld [vmem:[#allocation2 + $0x2f4] sm:$0xf0] }
 0x2cd   :  { %v613_v56 = vpop.xlane.xlu0 %612 }
 0x2ce   :  { %2534 = vrcp.f32 %v613_v56  ;;  %v625_v62 = vand.u32 2147483648, %v613_v56  ;;  %v623_v0 = vand.u32 2147483647, %v613_v56  ;;  %vm619_vm5 = vweird.f32 %v613_v56 }
 0x2d0   :  { %v626_v6 = vor.u32 1.1754944e-38, %v625_v62  ;;  %vm624_vm7 = vcmp.eq.f32.partialorder %v623_v0, 8.507059e+37  ;;  %v2090_v62 = vor.u32 %v2459_v51, %v2089_v50  ;;  %v2081_v0 = vld [vmem:[#allocation2 + $0x150] sm:$0xf]  ;;  %v2217_v50 = vld [vmem:[#allocation2 + $0x260] sm:$0xf] }
 0x2d1   :  { %v2491_v51 = vld [vmem:[#allocation2 + $0x264] sm:$0xf0] }
 0x2d4   :  { %v2535_v57 = vpop.eup %2534 }
 0x2d5   :  { %v615_v60 = vmul.f32 %v2535_v57, %v613_v56  ;;  %vm620_vm4 = vweird.f32 %v2535_v57  ;;  %v2001_v56 = vld [vmem:[#allocation2 + $0xb0] sm:$0xf] }
 0x2d6   :  { %vm621_vm6 = vmor %vm619_vm5, %vm620_vm4 }
 0x2d7   :  { %v616_v61 = vsub.f32 1.0, %v615_v60  ;;  %v1929_v60 = vld [vmem:[#allocation2 + $0x20] sm:$0xf] }
 0x2d9   :  { %v617_v63 = vmul.f32 %v2535_v57, %v616_v61  ;;  %v2419_v61 = vld [vmem:[#allocation2 + $0x24] sm:$0xf0] }
 0x2db   :  { %v618_v5 = vadd.f32 %v2535_v57, %v617_v63  ;;  %v2154_v63 = vor.u32 %v2475_v53, %v2153_v52  ;;  %v2281_v52 = vld [vmem:[#allocation2 + $0x2e0] sm:$0xf]  ;;  %v2507_v53 = vld [vmem:[#allocation2 + $0x2e4] sm:$0xf0] }
 0x2dd   :  { %v622_v7 = vsel %vm621_vm6, %v2535_v57, %v618_v5  ;;  %v2437_v57 = vld [vmem:[#allocation2 + $0xb4] sm:$0xf0]  ;;  %v1930_v5 = vor.u32 %v2419_v61, %v1929_v60  ;;  %v2113_v60 = vld [vmem:[#allocation2 + $0x190] sm:$0xf] }
 0x2de   :  { %v627_v10 = vsel %vm624_vm7, %v626_v6, %v622_v7  ;;  %v2002_v4 = vor.u32 %v2437_v57, %v2001_v56  ;;  %v1993_v6 = vld [vmem:[#allocation2 + $0xa0] sm:$0xf]  ;;  %v2435_v7 = vld [vmem:[#allocation2 + $0xa4] sm:$0xf0]  ;;  %v2049_v56 = vld [vmem:[#allocation2 + $0x110] sm:$0xf] }
 0x2df   :  { %v628_v11 = vmul.f32 %v2533_v34, %v627_v10  ;;  %v2423_v34 = vld [vmem:[#allocation2 + $0x44] sm:$0xf0]  ;;  %v2082_v10 = vor.u32 %v2457_v1, %v2081_v0  ;;  %v1994_v17 = vor.u32 %v2435_v7, %v1993_v6  ;;  %v2449_v57 = vld [vmem:[#allocation2 + $0x114] sm:$0xf0]  ;;  %v1971_v6 = vld [vmem:[#allocation2 + $0x78] sm:$0xf0] }
 0x2e0   :  { %v1946_v43 = vor.u32 %v2423_v34, %v1945_v33  ;;  %1376 = vmatpush.bf16.msra.mxu1 %v2002_v4  ;;  %v2225_v33 = vld [vmem:[#allocation2 + $0x270] sm:$0xf]  ;;  %v2493_v34 = vld [vmem:[#allocation2 + $0x274] sm:$0xf0]  ;;  %v2050_v0 = vor.u32 %v2449_v57, %v2049_v56  ;;  %v2463_v4 = vld [vmem:[#allocation2 + $0x184] sm:$0xf0] }
 0x2e1   :  { %v2876_v12 = vpack.c.bf16 %v628_v11, %v628_v11  ;;  %v2146_v11 = vor.u32 %v2473_v3, %v2145_v2  ;;  %v2465_v61 = vld [vmem:[#allocation2 + $0x194] sm:$0xf0]  ;;  %v2447_v2 = vld [vmem:[#allocation2 + $0x104] sm:$0xf0]  ;;  %v2105_v3 = vld [vmem:[#allocation2 + $0x180] sm:$0xf] }
 0x2e2   :  { %1362 = vmatpush.bf16.msra.mxu0 %v1946_v43  ;;  %v2057_v43 = vld [vmem:[#allocation2 + $0x120] sm:$0xf]  ;;  %v2114_v1 = vor.u32 %v2465_v61, %v2113_v60  ;;  %v2444_v7 = vld [vmem:[#allocation2 + $0xf4] sm:$0xf]  ;;  %v2003_v60 = vld [vmem:[#allocation2 + $0xb8] sm:$0xf0] }
 0x2e3   :  { %1905 = vmatmul.msk.bf16.vlgmr.msra.gmra.mxu2 %vm556_vm2, %v2876_v12  ;;  %1906 = vmatmul.msk.bf16.vlgmr.msra.gmra.mxu3 %vm556_vm2, %v2876_v12  ;;  %v2058_v54 = vor.u32 %v2451_v44, %v2057_v43  ;;  %v2436_v57 = vld [vmem:[#allocation2 + $0xb4] sm:$0xf]  ;;  %v2185_v61 = vld [vmem:[#allocation2 + $0x220] sm:$0xf] }
 0x2e4   :  { %740 = vmatpush.bf16.msra.mxu2 %v676_v13  ;;  %753 = vmatpush.bf16.msra.mxu3 %v679_v14  ;;  %v2073_v13 = vld [vmem:[#allocation2 + $0x140] sm:$0xf]  ;;  %v2455_v14 = vld [vmem:[#allocation2 + $0x144] sm:$0xf0] }
 0x2e5   :  { %v2074_v23 = vor.u32 %v2455_v14, %v2073_v13  ;;  %1377 = vmatpush.bf16.msra.mxu1 %v1994_v17  ;;  %v2038_v13 = vor.u32 %v2444_v7, %v2035_v8  ;;  %v2426_v14 = vld [vmem:[#allocation2 + $0x64] sm:$0xf]  ;;  %v2027_v17 = vld [vmem:[#allocation2 + $0xe8] sm:$0xf0] }
 0x2e6   :  { %1363 = vmatpush.bf16.msra.mxu0 %v1938_v55  ;;  %v2122_v55 = vor.u32 %v2467_v46, %v2121_v45  ;;  %v2030_v19 = vor.u32 %v2442_v16, %v2027_v17  ;;  %v2438_v45 = vld [vmem:[#allocation2 + $0xc4] sm:$0xf]  ;;  %v2011_v46 = vld [vmem:[#allocation2 + $0xc8] sm:$0xf0]  ;;  %v1923_v16 = vld [vmem:[#allocation2 + $0x18] sm:$0xf0] }
 0x2e7   :  { %v1995_v7 = vld [vmem:[#allocation2 + $0xa8] sm:$0xf0] }
 0x2e9   :  { %1378 = vmatpush.bf16.msra.mxu1 %v1986_v29  ;;  %v2440_v29 = vld [vmem:[#allocation2 + $0xd4] sm:$0xf] }
 0x2ea   :  { %1364 = vmatpush.bf16.msra.mxu0 %v1930_v5  ;;  %v2428_v5 = vld [vmem:[#allocation2 + $0x74] sm:$0xf] }
 0x2ed   :  { %1379 = vmatpush.bf16.msra.mxu1 %v1978_v47  ;;  %v2014_v47 = vor.u32 %v2438_v45, %v2011_v46 }
 0x2ee   :  { %1365 = vmatpush.bf16.msra.mxu0 %v1922_v18  ;;  %v1966_v18 = vor.u32 %v2426_v14, %v1963_v15  ;;  %v2497_v14 = vld [vmem:[#allocation2 + $0x294] sm:$0xf0]  ;;  %v2416_v15 = vld [vmem:[#allocation2 + $0x14] sm:$0xf] }
 0x2f2   :  { %1366 = vmatpush.bf16.msra.mxu0 %v1914_v31  ;;  %v2022_v31 = vor.u32 %v2440_v29, %v2019_v30 }
 0x2f3   :  { %1907 = vmatmul.msk.bf16.vlgmr.msrb.gmra.mxu2 %vm556_vm2, %v2876_v12  ;;  %1908 = vmatmul.msk.bf16.vlgmr.msrb.gmra.mxu3 %vm556_vm2, %v2876_v12 }
 0x2f4   :  { %1385 = vmatpush.bf16.msrb.mxu2 %v2098_v48  ;;  %1398 = vmatpush.bf16.msrb.mxu3 %v2162_v49  ;;  %v2226_v48 = vor.u32 %v2493_v34, %v2225_v33  ;;  %v2290_v49 = vor.u32 %v2509_v36, %v2289_v35  ;;  %v2487_v33 = vld [vmem:[#allocation2 + $0x244] sm:$0xf0]  ;;  %v2265_v34 = vld [vmem:[#allocation2 + $0x2c0] sm:$0xf] }
 0x2f5   :  { %v2202_v35 = vor.u32 %v2487_v33, %v2201_v32  ;;  %v2503_v36 = vld [vmem:[#allocation2 + $0x2c4] sm:$0xf0]  ;;  %v1979_v32 = vld [vmem:[#allocation2 + $0x88] sm:$0xf0] }
 0x2f6   :  { %1411 = vmatpush.bf16.msrb.mxu0 %v2226_v48  ;;  %1424 = vmatpush.bf16.msrb.mxu1 %v2290_v49  ;;  %v2266_v43 = vor.u32 %v2503_v36, %v2265_v34  ;;  %v2193_v48 = vld [vmem:[#allocation2 + $0x230] sm:$0xf]  ;;  %v2485_v49 = vld [vmem:[#allocation2 + $0x234] sm:$0xf0]  ;;  %v759_v34 = vunpack.c.l.bf16 %v2748_v37  ;;  %v2460_v36 = vld [vmem:[#allocation2 + $0x174] sm:$0xf] }
 0x2f7   :  { %v2155_v37 = vld [vmem:[#allocation2 + $0x1e8] sm:$0xf0] }
 0x2f8   :  { %1386 = vmatpush.bf16.msrb.mxu2 %v2090_v62  ;;  %1399 = vmatpush.bf16.msrb.mxu3 %v2154_v63  ;;  %v2218_v62 = vor.u32 %v2491_v51, %v2217_v50  ;;  %v2282_v63 = vor.u32 %v2507_v53, %v2281_v52  ;;  %v2257_v50 = vld [vmem:[#allocation2 + $0x2b0] sm:$0xf]  ;;  %v2194_v51 = vor.u32 %v2485_v49, %v2193_v48  ;;  %v2501_v52 = vld [vmem:[#allocation2 + $0x2b4] sm:$0xf0]  ;;  %v2420_v53 = vld [vmem:[#allocation2 + $0x34] sm:$0xf] }
 0x2fa   :  { %1412 = vmatpush.bf16.msrb.mxu0 %v2218_v62  ;;  %1425 = vmatpush.bf16.msrb.mxu1 %v2282_v63  ;;  %v2006_v62 = vor.u32 %v2436_v57, %v2003_v60  ;;  %v2483_v63 = vld [vmem:[#allocation2 + $0x224] sm:$0xf0]  ;;  %v2083_v57 = vld [vmem:[#allocation2 + $0x158] sm:$0xf0]  ;;  %v2472_v60 = vld [vmem:[#allocation2 + $0x1d4] sm:$0xf] }
 0x2fc   :  { %1387 = vmatpush.bf16.msrb.mxu2 %v2082_v10  ;;  %1400 = vmatpush.bf16.msrb.mxu3 %v2146_v11  ;;  %v2106_v10 = vor.u32 %v2463_v4, %v2105_v3  ;;  %v1974_v11 = vor.u32 %v2428_v5, %v1971_v6  ;;  %v2418_v3 = vld [vmem:[#allocation2 + $0x24] sm:$0xf]  ;;  %v1931_v4 = vld [vmem:[#allocation2 + $0x28] sm:$0xf0] }
 0x2fd   :  { %v2434_v5 = vld [vmem:[#allocation2 + $0xa4] sm:$0xf]  ;;  %v1934_v6 = vor.u32 %v2418_v3, %v1931_v4  ;;  %v2139_v4 = vld [vmem:[#allocation2 + $0x1c8] sm:$0xf0] }
 0x2fe   :  { %v1998_v8 = vor.u32 %v2434_v5, %v1995_v7  ;;  %v2470_v3 = vld [vmem:[#allocation2 + $0x1c4] sm:$0xf]  ;;  %v761_v5 = vunpack.c.l.bf16 %v2763_v41  ;;  %v2492_v7 = vld [vmem:[#allocation2 + $0x274] sm:$0xf] }
 0x300   :  { %1388 = vmatpush.bf16.msrb.mxu2 %v2074_v23  ;;  %1401 = vmatpush.bf16.msrb.mxu3 %v2138_v24  ;;  %v2210_v23 = vor.u32 %v2489_v21, %v2209_v20  ;;  %v2505_v24 = vld [vmem:[#allocation2 + $0x2d4] sm:$0xf0]  ;;  %v1987_v20 = vld [vmem:[#allocation2 + $0x98] sm:$0xf0] }
 0x301   :  { %v2274_v27 = vor.u32 %v2505_v24, %v2273_v22  ;;  %v2169_v22 = vld [vmem:[#allocation2 + $0x200] sm:$0xf] }
 0x302   :  { %1413 = vmatpush.bf16.msrb.mxu0 %v2210_v23  ;;  %v2479_v23 = vld [vmem:[#allocation2 + $0x204] sm:$0xf0]  ;;  %v2233_v24 = vld [vmem:[#allocation2 + $0x280] sm:$0xf] }
 0x303   :  { %1909 = vmatmul.msk.bf16.vlgmr.msra.gmra.mxu2 %vm556_vm2, %v2876_v12  ;;  %1910 = vmatmul.msk.bf16.vlgmr.msra.gmra.mxu3 %vm556_vm2, %v2876_v12  ;;  %v2041_v12 = vld [vmem:[#allocation2 + $0x100] sm:$0xf]  ;;  %v2170_v25 = vor.u32 %v2479_v23, %v2169_v22  ;;  %v2234_v29 = vor.u32 %v2495_v26, %v2233_v24  ;;  %v2490_v23 = vld [vmem:[#allocation2 + $0x264] sm:$0xf] }
 0x304   :  { %1389 = vmatpush.bf16.msrb.mxu2 %v2066_v39  ;;  %1402 = vmatpush.bf16.msrb.mxu3 %v2130_v40  ;;  %v2042_v9 = vor.u32 %v2447_v2, %v2041_v12  ;;  %v2422_v39 = vld [vmem:[#allocation2 + $0x44] sm:$0xf]  ;;  %v1947_v40 = vld [vmem:[#allocation2 + $0x48] sm:$0xf0]  ;;  %v2186_v12 = vor.u32 %v2483_v63, %v2185_v61  ;;  %v2147_v61 = vld [vmem:[#allocation2 + $0x1d8] sm:$0xf0] }
 0x305   :  { %1426 = vmatpush.bf16.msrb.mxu1 %v2274_v27  ;;  %v1950_v44 = vor.u32 %v2422_v39, %v1947_v40  ;;  %v2414_v27 = vld [vmem:[#allocation2 + $0x4] sm:$0xf]  ;;  %v2099_v39 = vld [vmem:[#allocation2 + $0x178] sm:$0xf0]  ;;  %v2476_v40 = vld [vmem:[#allocation2 + $0x1f4] sm:$0xf] }
 0x306   :  { %1414 = vmatpush.bf16.msrb.mxu0 %v2202_v35  ;;  %v760_v35 = vunpack.c.l.bf16 %v2750_v38  ;;  %v2102_v48 = vor.u32 %v2460_v36, %v2099_v39  ;;  %v2506_v26 = vld [vmem:[#allocation2 + $0x2e4] sm:$0xf]  ;;  %v2488_v36 = vld [vmem:[#allocation2 + $0x254] sm:$0xf]  ;;  %v2211_v39 = vld [vmem:[#allocation2 + $0x258] sm:$0xf0] }
 0x308   :  { %1390 = vmatpush.bf16.msrb.mxu2 %v2058_v54  ;;  %1403 = vmatpush.bf16.msrb.mxu3 %v2122_v55  ;;  %v1939_v54 = vld [vmem:[#allocation2 + $0x38] sm:$0xf0]  ;;  %v2258_v55 = vor.u32 %v2501_v52, %v2257_v50  ;;  %v2458_v50 = vld [vmem:[#allocation2 + $0x164] sm:$0xf] }
 0x309   :  { %1427 = vmatpush.bf16.msrb.mxu1 %v2266_v43  ;;  %v1942_v56 = vor.u32 %v2420_v53, %v1939_v54  ;;  %v2163_v43 = vld [vmem:[#allocation2 + $0x1f8] sm:$0xf0]  ;;  %v2091_v53 = vld [vmem:[#allocation2 + $0x168] sm:$0xf0]  ;;  %v2474_v54 = vld [vmem:[#allocation2 + $0x1e4] sm:$0xf] }
 0x30a   :  { %1415 = vmatpush.bf16.msrb.mxu0 %v2194_v51  ;;  %v2166_v49 = vor.u32 %v2476_v40, %v2163_v43  ;;  %v2094_v38 = vor.u32 %v2458_v50, %v2091_v53  ;;  %v2504_v40 = vld [vmem:[#allocation2 + $0x2d4] sm:$0xf]  ;;  %v2275_v43 = vld [vmem:[#allocation2 + $0x2d8] sm:$0xf0] }
 0x30b   :  { %v2464_v50 = vld [vmem:[#allocation2 + $0x194] sm:$0xf]  ;;  %v2115_v53 = vld [vmem:[#allocation2 + $0x198] sm:$0xf0] }
 0x30c   :  { %1391 = vmatpush.bf16.msrb.mxu2 %v2050_v0  ;;  %1404 = vmatpush.bf16.msrb.mxu3 %v2114_v1  ;;  %v2249_v0 = vld [vmem:[#allocation2 + $0x2a0] sm:$0xf]  ;;  %v2499_v1 = vld [vmem:[#allocation2 + $0x2a4] sm:$0xf0] }
 0x30d   :  { %1428 = vmatpush.bf16.msrb.mxu1 %v2258_v55  ;;  %v2250_v2 = vor.u32 %v2499_v1, %v2249_v0  ;;  %v2158_v55 = vor.u32 %v2474_v54, %v2155_v37  ;;  %v2150_v1 = vor.u32 %v2472_v60, %v2147_v61  ;;  %v2214_v54 = vor.u32 %v2488_v36, %v2211_v39  ;;  %v2517_v36 = vld [vmem:[%s2983_s12 + $0x38] sm:$0xff]  ;;  %v2516_v39 = vld [vmem:[%s2983_s12 + $0x30] sm:$0xff] }
 0x30e   :  { %1416 = vmatpush.bf16.msrb.mxu0 %v2186_v12  ;;  %v2454_v12 = vld [vmem:[#allocation2 + $0x144] sm:$0xf]  ;;  %v2278_v37 = vor.u32 %v2504_v40, %v2275_v43  ;;  %v2118_v61 = vor.u32 %v2464_v50, %v2115_v53  ;;  %v2515_v40 = vld [vmem:[%s2983_s12 + $0x28] sm:$0xff]  ;;  %v2512_v43 = vld [vmem:[%s2983_s12 + $0x10] sm:$0xff] }
 0x30f   :  { %v2523_v50 = vld [vmem:[%s2983_s12 + $0x68] sm:$0xff] }
 0x310   :  { %1392 = vmatpush.bf16.msrb.mxu2 %v2042_v9  ;;  %1405 = vmatpush.bf16.msrb.mxu3 %v2106_v10  ;;  %v2177_v9 = vld [vmem:[#allocation2 + $0x210] sm:$0xf]  ;;  %v2481_v10 = vld [vmem:[#allocation2 + $0x214] sm:$0xf0] }
 0x311   :  { %1429 = vmatpush.bf16.msrb.mxu1 %v2250_v2  ;;  %v2075_v2 = vld [vmem:[#allocation2 + $0x148] sm:$0xf0] }
 0x314   :  { %1437 = vmatpush.bf16.msra.mxu2 %v1974_v11  ;;  %1450 = vmatpush.bf16.msra.mxu3 %v2038_v13  ;;  %v2241_v11 = vld [vmem:[#allocation2 + $0x290] sm:$0xf]  ;;  %v2178_v13 = vor.u32 %v2481_v10, %v2177_v9  ;;  %v2078_v9 = vor.u32 %v2454_v12, %v2075_v2  ;;  %v2142_v10 = vor.u32 %v2470_v3, %v2139_v4  ;;  %v763_v12 = vunpack.c.l.bf16 %v2811_v58 }
 0x315   :  { %v2242_v17 = vor.u32 %v2497_v14, %v2241_v11  ;;  %v2508_v11 = vld [vmem:[#allocation2 + $0x2f4] sm:$0xf]  ;;  %v764_v2 = vunpack.c.l.bf16 %v2813_v59 }
 0x316   :  { %1417 = vmatpush.bf16.msrb.mxu0 %v2178_v13  ;;  %v2291_v13 = vld [vmem:[#allocation2 + $0x2f8] sm:$0xf0]  ;;  %v2452_v14 = vld [vmem:[#allocation2 + $0x134] sm:$0xf] }
 0x317   :  { %1430 = vmatpush.bf16.msrb.mxu1 %v2242_v17  ;;  %v2067_v17 = vld [vmem:[#allocation2 + $0x138] sm:$0xf0]  ;;  %v2294_v41 = vor.u32 %v2508_v11, %v2291_v13  ;;  %v2500_v11 = vld [vmem:[#allocation2 + $0x2b4] sm:$0xf] }
 0x318   :  { %1438 = vmatpush.bf16.msra.mxu2 %v1966_v18  ;;  %1451 = vmatpush.bf16.msra.mxu3 %v2030_v19  ;;  %v1926_v18 = vor.u32 %v2416_v15, %v1923_v16  ;;  %v2432_v19 = vld [vmem:[#allocation2 + $0x94] sm:$0xf]  ;;  %v2259_v13 = vld [vmem:[#allocation2 + $0x2b8] sm:$0xf0] }
 0x319   :  { %v1990_v21 = vor.u32 %v2432_v19, %v1987_v20  ;;  %v2131_v19 = vld [vmem:[#allocation2 + $0x1b8] sm:$0xf0] }
 0x31a   :  { %1418 = vmatpush.bf16.msrb.mxu0 %v2170_v25 }
 0x31b   :  { %1431 = vmatpush.bf16.msrb.mxu1 %v2234_v29 }
 0x31c   :  { %1439 = vmatpush.bf16.msra.mxu2 %v1958_v28  ;;  %1452 = vmatpush.bf16.msra.mxu3 %v2022_v31  ;;  %v1915_v28 = vld [vmem:[#allocation2 + $0x8] sm:$0xf0]  ;;  %v2430_v31 = vld [vmem:[#allocation2 + $0x84] sm:$0xf] }
 0x31d   :  { %v1918_v30 = vor.u32 %v2414_v27, %v1915_v28  ;;  %v1982_v33 = vor.u32 %v2430_v31, %v1979_v32  ;;  %v2283_v27 = vld [vmem:[#allocation2 + $0x2e8] sm:$0xf0]  ;;  %v2070_v28 = vor.u32 %v2452_v14, %v2067_v17  ;;  %v2466_v32 = vld [vmem:[#allocation2 + $0x1a4] sm:$0xf]  ;;  %v2262_v17 = vor.u32 %v2500_v11, %v2259_v13 }
 0x31e   :  { %v2059_v31 = vld [vmem:[#allocation2 + $0x128] sm:$0xf0] }
 0x320   :  { %1440 = vmatpush.bf16.msra.mxu2 %v1950_v44  ;;  %1453 = vmatpush.bf16.msra.mxu3 %v2014_v47 }
 0x324   :  { %1441 = vmatpush.bf16.msra.mxu2 %v1942_v56  ;;  %1454 = vmatpush.bf16.msra.mxu3 %v2006_v62  ;;  %v2456_v56 = vld [vmem:[#allocation2 + $0x154] sm:$0xf] }
 0x325   :  { %v2086_v0 = vor.u32 %v2456_v56, %v2083_v57  ;;  %v2502_v56 = vld [vmem:[#allocation2 + $0x2c4] sm:$0xf]  ;;  %v2267_v57 = vld [vmem:[#allocation2 + $0x2c8] sm:$0xf0] }
 0x326   :  { %v2270_v4 = vor.u32 %v2502_v56, %v2267_v57  ;;  %v2520_v57 = vld [vmem:[%s2983_s12 + $0x50] sm:$0xff] }
 0x328   :  { %1442 = vmatpush.bf16.msra.mxu2 %v1934_v6  ;;  %1455 = vmatpush.bf16.msra.mxu3 %v1998_v8  ;;  %v762_v6 = vunpack.c.l.bf16 %v2768_v42  ;;  %v2227_v8 = vld [vmem:[#allocation2 + $0x278] sm:$0xf0]  ;;  %v2219_v42 = vld [vmem:[#allocation2 + $0x268] sm:$0xf0] }
 0x329   :  { %v2230_v22 = vor.u32 %v2492_v7, %v2227_v8 }
 0x32c   :  { %1443 = vmatpush.bf16.msra.mxu2 %v1926_v18  ;;  %1456 = vmatpush.bf16.msra.mxu3 %v1990_v21  ;;  %v2468_v18 = vld [vmem:[#allocation2 + $0x1b4] sm:$0xf] }
 0x32d   :  { %v2134_v29 = vor.u32 %v2468_v18, %v2131_v19  ;;  %v2482_v18 = vld [vmem:[#allocation2 + $0x224] sm:$0xf]  ;;  %v2187_v19 = vld [vmem:[#allocation2 + $0x228] sm:$0xf0] }
 0x330   :  { %1444 = vmatpush.bf16.msra.mxu2 %v1918_v30  ;;  %1457 = vmatpush.bf16.msra.mxu3 %v1982_v33  ;;  %v2450_v30 = vld [vmem:[#allocation2 + $0x124] sm:$0xf]  ;;  %v2123_v33 = vld [vmem:[#allocation2 + $0x1a8] sm:$0xf0] }
 0x366   :  { %v690_v44 = vpop.f32.mrf.mxu2  ;;  %v703_v45 = vpop.f32.mrf.mxu3 }
 0x367   :  { %v765_v46 = vmul.f32 %v759_v34, %v690_v44  ;;  %v766_v47 = vmul.f32 %v760_v35, %v703_v45  ;;  %v2222_v34 = vor.u32 %v2490_v23, %v2219_v42  ;;  %v2286_v35 = vor.u32 %v2506_v26, %v2283_v27  ;;  %v2480_v23 = vld [vmem:[#allocation2 + $0x214] sm:$0xf]  ;;  %v2179_v27 = vld [vmem:[#allocation2 + $0x218] sm:$0xf0] }
 0x368   :  { %v2062_v44 = vor.u32 %v2450_v30, %v2059_v31  ;;  %v2126_v45 = vor.u32 %v2466_v32, %v2123_v33  ;;  %v2182_v30 = vor.u32 %v2480_v23, %v2179_v27  ;;  %v2478_v32 = vld [vmem:[#allocation2 + $0x204] sm:$0xf]  ;;  %v2171_v33 = vld [vmem:[#allocation2 + $0x208] sm:$0xf0] }
 0x369   :  { %v2894_v51 = vpack.c.bf16 %v765_v46, %v765_v46  ;;  %v2896_v52 = vpack.c.bf16 %v766_v47, %v766_v47  ;;  %v2448_v46 = vld [vmem:[#allocation2 + $0x114] sm:$0xf] }
 0x36b   :  { %1367 = vmatmul.bf16.vlgmr.msra.gmra.mxu0 %v2894_v51  ;;  %1380 = vmatmul.bf16.vlgmr.msra.gmra.mxu1 %v2896_v52 }
 0x36c   :  { %1463 = vmatpush.bf16.msra.mxu0 %v2102_v48  ;;  %1476 = vmatpush.bf16.msra.mxu1 %v2166_v49  ;;  %v2051_v49 = vld [vmem:[#allocation2 + $0x118] sm:$0xf0] }
 0x36d   :  { %v2054_v60 = vor.u32 %v2448_v46, %v2051_v49  ;;  %v2510_v49 = vld [vmem:[%s2983_s12] sm:$0xff] }
 0x36e   :  { %v692_v62 = vpop.f32.mrf.mxu2  ;;  %v705_v63 = vpop.f32.mrf.mxu3 }
 0x36f   :  { %v2446_v62 = vld [vmem:[#allocation2 + $0x104] sm:$0xf]  ;;  %v2043_v63 = vld [vmem:[#allocation2 + $0x108] sm:$0xf0] }
 0x370   :  { %1464 = vmatpush.bf16.msra.mxu0 %v2094_v38  ;;  %1477 = vmatpush.bf16.msra.mxu1 %v2158_v55  ;;  %v2486_v38 = vld [vmem:[#allocation2 + $0x244] sm:$0xf]  ;;  %v2203_v55 = vld [vmem:[#allocation2 + $0x248] sm:$0xf0]  ;;  %v2046_v7 = vor.u32 %v2446_v62, %v2043_v63 }
 0x371   :  { %v2206_v3 = vor.u32 %v2486_v38, %v2203_v55  ;;  %v873_v38 = vld [vmem:[%s2982_s11] sm:$0x3]  ;;  %v2521_v55 = vld [vmem:[%s2983_s12 + $0x58] sm:$0xff]  ;;  %v2519_v63 = vld [vmem:[%s2983_s12 + $0x48] sm:$0xff] }
 0x372   :  { %v875_v56 = vperm.slane %v873_v38, 0 }
 0x374   :  { %1465 = vmatpush.bf16.msra.mxu0 %v2086_v0  ;;  %1478 = vmatpush.bf16.msra.mxu1 %v2150_v1  ;;  %v2462_v0 = vld [vmem:[#allocation2 + $0x184] sm:$0xf]  ;;  %v2107_v1 = vld [vmem:[#allocation2 + $0x188] sm:$0xf0] }
 0x375   :  { %v2110_v8 = vor.u32 %v2462_v0, %v2107_v1 }
 0x376   :  { %v716_v15 = vpop.f32.mrf.mxu2  ;;  %v729_v16 = vpop.f32.mrf.mxu3 }
 0x377   :  { %v767_v20 = vmul.f32 %v761_v5, %v716_v15  ;;  %v768_v21 = vmul.f32 %v762_v6, %v729_v16  ;;  %v2484_v5 = vld [vmem:[#allocation2 + $0x234] sm:$0xf]  ;;  %v2195_v6 = vld [vmem:[#allocation2 + $0x238] sm:$0xf0] }
 0x378   :  { %1466 = vmatpush.bf16.msra.mxu0 %v2078_v9  ;;  %1479 = vmatpush.bf16.msra.mxu1 %v2142_v10  ;;  %v2198_v58 = vor.u32 %v2484_v5, %v2195_v6 }
 0x379   :  { %v2902_v24 = vpack.c.bf16 %v767_v20, %v767_v20  ;;  %v2904_v25 = vpack.c.bf16 %v768_v21, %v768_v21  ;;  %v2498_v20 = vld [vmem:[#allocation2 + $0x2a4] sm:$0xf]  ;;  %v2251_v21 = vld [vmem:[#allocation2 + $0x2a8] sm:$0xf0] }
 0x37b   :  { %1393 = vmatmul.bf16.vlgmr.msrb.gmra.mxu2 %v2902_v24  ;;  %1406 = vmatmul.bf16.vlgmr.msrb.gmra.mxu3 %v2904_v25 }
 0x37c   :  { %1489 = vmatpush.bf16.msrb.mxu2 %v2230_v22  ;;  %1502 = vmatpush.bf16.msrb.mxu3 %v2294_v41  ;;  %v2190_v22 = vor.u32 %v2482_v18, %v2187_v19  ;;  %v2254_v41 = vor.u32 %v2498_v20, %v2251_v21 }
 0x37d   :  { %1467 = vmatpush.bf16.msra.mxu0 %v2070_v28  ;;  %1480 = vmatpush.bf16.msra.mxu1 %v2134_v29  ;;  %v2496_v28 = vld [vmem:[#allocation2 + $0x294] sm:$0xf]  ;;  %v2243_v29 = vld [vmem:[#allocation2 + $0x298] sm:$0xf0] }
 0x37e   :  { %v718_v47 = vpop.f32.mrf.mxu2  ;;  %v731_v48 = vpop.f32.mrf.mxu3  ;;  %v2246_v31 = vor.u32 %v2496_v28, %v2243_v29 }
 0x37f   :  { %v2511_v47 = vld [vmem:[%s2983_s12 + $0x8] sm:$0xff]  ;;  %v2524_v48 = vld [vmem:[%s2983_s12 + $0x70] sm:$0xff] }
 0x380   :  { %1490 = vmatpush.bf16.msrb.mxu2 %v2222_v34  ;;  %1503 = vmatpush.bf16.msrb.mxu3 %v2286_v35  ;;  %v2494_v34 = vld [vmem:[#allocation2 + $0x284] sm:$0xf] }
 0x381   :  { %1468 = vmatpush.bf16.msra.mxu0 %v2062_v44  ;;  %1481 = vmatpush.bf16.msra.mxu1 %v2126_v45  ;;  %v2525_v44 = vld [vmem:[%s2983_s12 + $0x78] sm:$0xff] }
 0x384   :  { %1491 = vmatpush.bf16.msrb.mxu2 %v2214_v54  ;;  %1504 = vmatpush.bf16.msrb.mxu3 %v2278_v37  ;;  %v2522_v37 = vld [vmem:[%s2983_s12 + $0x60] sm:$0xff] }
 0x385   :  { %1469 = vmatpush.bf16.msra.mxu0 %v2054_v60  ;;  %1482 = vmatpush.bf16.msra.mxu1 %v2118_v61 }
 0x386   :  { %v742_v9 = vpop.f32.mrf.mxu2  ;;  %v755_v10 = vpop.f32.mrf.mxu3 }
 0x387   :  { %v769_v14 = vmul.f32 %v763_v12, %v742_v9  ;;  %v770_v15 = vmul.f32 %v764_v2, %v755_v10  ;;  %v2518_v12 = vld [vmem:[%s2983_s12 + $0x40] sm:$0xff] }
 0x388   :  { %1492 = vmatpush.bf16.msrb.mxu2 %v2206_v3  ;;  %1505 = vmatpush.bf16.msrb.mxu3 %v2270_v4 }
 0x389   :  { %v775_v59 = vpack.c.bf16 %v769_v14, %v769_v14  ;;  %v776_v16 = vpack.c.bf16 %v770_v15, %v770_v15  ;;  %1470 = vmatpush.bf16.msra.mxu0 %v2046_v7  ;;  %1483 = vmatpush.bf16.msra.mxu1 %v2110_v8  ;;  %v876_v14 = vperm.slane %v873_v38, 1 }
 0x38b   :  { %1419 = vmatmul.bf16.vlgmr.msrb.gmra.mxu0 %v775_v59  ;;  %1432 = vmatmul.bf16.vlgmr.msrb.gmra.mxu1 %v776_v16 }
 0x38c   :  { %1445 = vmatmul.bf16.vlgmr.msra.gmra.mxu2 %v2894_v51  ;;  %1458 = vmatmul.bf16.vlgmr.msra.gmra.mxu3 %v2896_v52  ;;  %v2235_v51 = vld [vmem:[#allocation2 + $0x288] sm:$0xf0]  ;;  %v2174_v52 = vor.u32 %v2478_v32, %v2171_v33 }
 0x38d   :  { %1493 = vmatpush.bf16.msrb.mxu2 %v2198_v58  ;;  %1506 = vmatpush.bf16.msrb.mxu3 %v2262_v17  ;;  %v2238_v35 = vor.u32 %v2494_v34, %v2235_v51  ;;  %v2531_v51 = vld [vmem:[%s2984_s13] ss:$0 sm:$0xff] }
 0x38e   :  { %v744_v42 = vpop.f32.mrf.mxu2  ;;  %v757_v26 = vpop.f32.mrf.mxu3  ;;  %1651 = vmatpush.bf16.msrb.mxu0 %v2517_v36  ;;  %1664 = vmatpush.bf16.msrb.mxu1 %v2525_v44 }
 0x391   :  { %1494 = vmatpush.bf16.msrb.mxu2 %v2190_v22  ;;  %1507 = vmatpush.bf16.msrb.mxu3 %v2254_v41 }
 0x392   :  { %1652 = vmatpush.bf16.msrb.mxu0 %v2516_v39  ;;  %1665 = vmatpush.bf16.msrb.mxu1 %v2524_v48 }
 0x395   :  { %1495 = vmatpush.bf16.msrb.mxu2 %v2182_v30  ;;  %1508 = vmatpush.bf16.msrb.mxu3 %v2246_v31 }
 0x396   :  { %1653 = vmatpush.bf16.msrb.mxu0 %v2515_v40  ;;  %1666 = vmatpush.bf16.msrb.mxu1 %v2523_v50 }
 0x399   :  { %1496 = vmatpush.bf16.msrb.mxu2 %v2174_v52  ;;  %1509 = vmatpush.bf16.msrb.mxu3 %v2238_v35 }
 0x39a   :  { %1667 = vmatpush.bf16.msrb.mxu1 %v2522_v37 }
 0x39b   :  { %1471 = vmatmul.bf16.vlgmr.msra.gmra.mxu0 %v2902_v24  ;;  %1484 = vmatmul.bf16.vlgmr.msra.gmra.mxu1 %v2904_v25  ;;  %v2514_v24 = vld [vmem:[%s2983_s12 + $0x20] sm:$0xff]  ;;  %v2513_v25 = vld [vmem:[%s2983_s12 + $0x18] sm:$0xff] }
 0x39c   :  { %1497 = vmatmul.bf16.vlgmr.msrb.gmra.mxu2 %v775_v59  ;;  %1510 = vmatmul.bf16.vlgmr.msrb.gmra.mxu3 %v776_v16 }
 0x39d   :  { %1654 = vmatpush.bf16.msrb.mxu0 %v2514_v24 }
 0x39e   :  { %1668 = vmatpush.bf16.msrb.mxu1 %v2521_v55 }
 0x3a1   :  { %1655 = vmatpush.bf16.msrb.mxu0 %v2513_v25 }
 0x3a2   :  { %1669 = vmatpush.bf16.msrb.mxu1 %v2520_v57 }
 0x3a5   :  { %1656 = vmatpush.bf16.msrb.mxu0 %v2512_v43 }
 0x3a6   :  { %1670 = vmatpush.bf16.msrb.mxu1 %v2519_v63 }
 0x3a9   :  { %1657 = vmatpush.bf16.msrb.mxu0 %v2511_v47 }
 0x3aa   :  { %1671 = vmatpush.bf16.msrb.mxu1 %v2518_v12 }
 0x3ad   :  { %1658 = vmatpush.bf16.msrb.mxu0 %v2510_v49 }
 0x3e8   :  { %v1368_v45 = vpop.f32.mrf.mxu0  ;;  %v1381_v46 = vpop.f32.mrf.mxu1 }
 0x3e9   :  { %v1369_v60 = vadd.f32 %v1368_v45, %v875_v56 }
 0x3eb   :  { %v1382_v0 = vadd.f32 %v1381_v46, %v1369_v60 }
 0x3f0   :  { %v1370_v53 = vpop.f32.mrf.mxu0  ;;  %v1383_v54 = vpop.f32.mrf.mxu1 }
 0x3fe   :  { %v1394_v61 = vpop.f32.mrf.mxu2  ;;  %v1407_v62 = vpop.f32.mrf.mxu3 }
 0x3ff   :  { %v1395_v1 = vadd.f32 %v1394_v61, %v1382_v0 }
 0x401   :  { %v1408_v4 = vadd.f32 %v1407_v62, %v1395_v1 }
 0x406   :  { %v1396_v2 = vpop.f32.mrf.mxu2  ;;  %v1409_v3 = vpop.f32.mrf.mxu3 }
 0x408   :  { %v1420_v5 = vpop.f32.mrf.mxu0  ;;  %v1433_v6 = vpop.f32.mrf.mxu1 }
 0x409   :  { %v1421_v7 = vadd.f32 %v1420_v5, %v1408_v4 }
 0x40b   :  { %v1434_v8 = vadd.f32 %v1433_v6, %v1421_v7 }
 0x40d   :  { %v1515_v9 = vmax.f32 %v1434_v8, 0.0 }
 0x40f   :  { %v1517_v10 = vpack.c.bf16 %v1515_v9, %v1515_v9  ;;  %v1446_v11 = vpop.f32.mrf.mxu2  ;;  %v1459_v13 = vpop.f32.mrf.mxu3 }
 0x410   :  { %v1422_v15 = vpop.f32.mrf.mxu0  ;;  %v1435_v58 = vpop.f32.mrf.mxu1  ;;  %v1447_v59 = vadd.f32 %v1446_v11, %v876_v14 }
 0x411   :  { %1659 = vmatmul.bf16.vlgmr.msrb.gmra.mxu0 %v1517_v10 }
 0x412   :  { %v1460_v18 = vadd.f32 %v1459_v13, %v1447_v59 }
 0x417   :  { %v1448_v16 = vpop.f32.mrf.mxu2  ;;  %v1461_v17 = vpop.f32.mrf.mxu3 }
 0x418   :  { %v1472_v19 = vpop.f32.mrf.mxu0  ;;  %v1485_v20 = vpop.f32.mrf.mxu1 }
 0x419   :  { %v1473_v21 = vadd.f32 %v1472_v19, %v1460_v18 }
 0x41b   :  { %v1486_v22 = vadd.f32 %v1485_v20, %v1473_v21 }
 0x41f   :  { %v1498_v41 = vpop.f32.mrf.mxu2  ;;  %v1511_v23 = vpop.f32.mrf.mxu3 }
 0x420   :  { %v1499_v42 = vadd.f32 %v1498_v41, %v1486_v22  ;;  %v1474_v26 = vpop.f32.mrf.mxu0  ;;  %v1487_v27 = vpop.f32.mrf.mxu1 }
 0x422   :  { %v1512_v28 = vadd.f32 %v1511_v23, %v1499_v42 }
 0x424   :  { %v1516_v29 = vmax.f32 %v1512_v28, 0.0 }
 0x426   :  { %v1518_v30 = vpack.c.bf16 %v1516_v29, %v1516_v29 }
 0x427   :  { %v1500_v31 = vpop.f32.mrf.mxu2  ;;  %v1513_v32 = vpop.f32.mrf.mxu3 }
 0x428   :  { %1672 = vmatmul.bf16.vlgmr.msrb.gmra.mxu1 %v1518_v30 }
 0x48e   :  { %v1660_v33 = vpop.f32.mrf.mxu0 }
 0x48f   :  { %v1661_v52 = vadd.f32 %v2531_v51, %v1660_v33 }
 0x496   :  { %v1662_v34 = vpop.f32.mrf.mxu0 }
 0x4a5   :  { %v1673_v35 = vpop.f32.mrf.mxu1 }
 0x4a6   :  { %v1674_v36 = vadd.f32 %v1673_v35, %v1661_v52 }
 0x4a8   :  { %1677 = vst [vmem:[%s2985_s14] sm:$0xff] %v1674_v36 }
 0x4ad   :  { %v1675_v39 = vpop.f32.mrf.mxu1 }
 0x4ae   :  { %1682 = vsyncpa [#allocation3], 1 }

</bundles_post_ra>
